<compile_context>
chip_gen: v7x
topology: tpu7x:2x2x1
jax: 0.10.0
libtpu: 0.0.40
codegen_flags: <defaults>
</compile_context>

<pallas_src>
import functools

import jax
import jax.numpy as jnp
from jax.experimental import pallas as pl
from jax.experimental.pallas import tpu as pltpu


def _mha_kernel(key_ref, value_ref, query_ref,
                wq_ref, bq_ref, wk_ref, bk_ref, wv_ref, bv_ref,
                out_ref, *, num_heads: int, head_size: int, compute_dtype):
    nb, S, E = query_ref.shape            # block: (batch_block, S, E)
    scale = 1.0 / (head_size ** 0.5)

    # Merge the (nb, S) leading dims once: the projection matmuls then see a
    # sublane-dense (nb*S, E) operand.  (Leading-dim merge -> no relayout.)
    q_in = query_ref[...].reshape(nb * S, E).astype(compute_dtype)
    k_in = key_ref[...].reshape(nb * S, E).astype(compute_dtype)
    v_in = value_ref[...].reshape(nb * S, E).astype(compute_dtype)

    head_ctx = []  # per-head (nb, S, D) f32 context, concatenated once at the end

    # Static per-head loop; weights/biases are indexed on their *leading* axis
    # (wq_ref[h]) so no lane slicing / XLU relayout touches the activations.
    # TODO(synk): for num_heads >= 16 switch to lax.fori_loop over a stacked
    # (H, ...) value to bound vreg live ranges.
    for h in range(num_heads):
        # Projections on the MXU with f32 accumulation; fold 1/sqrt(D) into q
        # once here instead of scaling every (S, S) score matrix.
        qh = ((jnp.dot(q_in, wq_ref[h], preferred_element_type=jnp.float32)
               + bq_ref[h]) * scale).reshape(nb, S, head_size)
        kh = (jnp.dot(k_in, wk_ref[h], preferred_element_type=jnp.float32)
              + bk_ref[h]).reshape(nb, S, head_size)
        vh = (jnp.dot(v_in, wv_ref[h], preferred_element_type=jnp.float32)
              + bv_ref[h]).reshape(nb, S, head_size)

        # q @ k^T contracting the last dims of both operands (no explicit .T),
        # batched over the collapsed batch rows.
        s = jnp.einsum("bqd,bkd->bqk",
                       qh.astype(compute_dtype), kh.astype(compute_dtype),
                       preferred_element_type=jnp.float32)        # (nb, S, S)

        # Numerically-stable softmax kept in f32 (v5e has no bf16 VPU/EUP);
        # the denominator reciprocal goes to the EUP and co-issues for free.
        s = s - jnp.max(s, axis=-1, keepdims=True)
        e = jnp.exp(s)
        p = e * pl.reciprocal(jnp.sum(e, axis=-1, keepdims=True), approx=True)

        ctx = jnp.einsum("bqk,bkd->bqd",
                         p.astype(compute_dtype), vh.astype(compute_dtype),
                         preferred_element_type=jnp.float32)      # (nb, S, D)
        head_ctx.append(ctx)

    # One lane-dense store of the whole (nb, S, H*D) slab instead of H narrow
    # masked stores.
    out_ref[...] = jnp.concatenate(head_ctx, axis=-1).astype(out_ref.dtype)

    # TODO(synk): optional additive attention `mask` (the forward's `if mask:`
    # branch) is not implemented; the default mask=None path is reproduced.
    # TODO(synk): for long sequences on v7x (64 MiB VMEM) add a q-tile grid
    # axis with flash-style online softmax over k/v tiles.


def _vmem_limit_bytes(nb, S, E, HD, w_itemsize):
    blocks = 2 * 3 * nb * S * E * 4 + 2 * nb * S * HD * 4   # double-buffered q/k/v in + out
    weights = 3 * (E * HD * w_itemsize + HD * 4)            # single-buffered W + f32 bias
    interm = 4 * nb * S * HD * 4 + 3 * nb * S * S * 4       # projections + scores/probs
    est = 2 * (blocks + weights + interm)                   # 2x headroom
    return int(min(64 * 1024 * 1024, max(32 * 1024 * 1024, est)))


def multi_head_attention(key, value, query, params, *, num_heads: int,
                         head_size: int, compute_dtype=jnp.float32,
                         batch_block=None):
    """key/value/query: (B, S, E) float32.  Returns (B, S, num_heads*head_size) f32."""
    B, S, E = key.shape
    D = head_size
    HD = num_heads * head_size
    wq, bq, wk, bk, wv, bv = params
    w_itemsize = jnp.dtype(compute_dtype).itemsize

    # Collapse small batches into one block so the projection matmuls are
    # sublane-dense and per-grid-step overhead is amortized.
    if batch_block is None:
        cap = max(1, 1024 // max(S, 1))
        batch_block = 1
        for cand in range(min(B, cap), 0, -1):
            if B % cand == 0:
                batch_block = cand
                break
    assert B % batch_block == 0, "batch_block must divide B"
    nb = batch_block
    grid = (B // nb,)

    # Pre-split projection params per head OUTSIDE the kernel:
    #   W: (E, H*D) -> (H, E, D),   b: (1, H*D) -> (H, 1, D)
    # so the kernel only ever indexes the (free) leading head axis.  In bf16
    # mode the weights are kept bf16 in HBM (halves weight DMA / VMEM).
    def split_w(w):
        return w.reshape(E, num_heads, D).transpose(1, 0, 2).astype(compute_dtype)

    def split_b(b):
        return b.reshape(num_heads, 1, D).astype(jnp.float32)

    args = (key, value, query,
            split_w(wq), split_b(bq),
            split_w(wk), split_b(bk),
            split_w(wv), split_b(bv))

    kernel = functools.partial(_mha_kernel, num_heads=num_heads,
                               head_size=D, compute_dtype=compute_dtype)

    cost = pl.CostEstimate(
        flops=2 * B * S * E * 3 * HD + 4 * B * num_heads * S * S * D,
        transcendentals=B * num_heads * S * S,
        bytes_accessed=(3 * B * S * E + B * S * HD) * 4
                       + 3 * (E * HD) * w_itemsize + 3 * HD * 4,
    )

    def build(weight_pipeline_mode):
        wkw = {} if weight_pipeline_mode is None else dict(
            pipeline_mode=weight_pipeline_mode)
        x_spec = pl.BlockSpec((nb, S, E), lambda i: (i, 0, 0))
        w_spec = pl.BlockSpec((num_heads, E, D), lambda i: (0, 0, 0), **wkw)
        b_spec = pl.BlockSpec((num_heads, 1, D), lambda i: (0, 0, 0), **wkw)
        out_spec = pl.BlockSpec((nb, S, HD), lambda i: (i, 0, 0))
        return pl.pallas_call(
            kernel,
            out_shape=jax.ShapeDtypeStruct((B, S, HD), jnp.float32),
            grid_spec=pltpu.PrefetchScalarGridSpec(
                num_scalar_prefetch=0,
                grid=grid,
                in_specs=[x_spec, x_spec, x_spec,
                          w_spec, b_spec, w_spec, b_spec, w_spec, b_spec],
                out_specs=out_spec,
            ),
            compiler_params=pltpu.CompilerParams(
                dimension_semantics=("parallel",),
                vmem_limit_bytes=_vmem_limit_bytes(nb, S, E, HD, w_itemsize),
            ),
            cost_estimate=cost,
        )

    try:
        # Grid-invariant weights/biases: request single buffering to halve
        # their VMEM footprint.
        return build(pl.Buffered(1))(*args)
    except Exception:
        # pipeline_mode / Buffered(1) not supported by this jax build: fall
        # back to the default double-buffered specs (correctness unaffected).
        return build(None)(*args)


def _reference(key, value, query, params, num_heads, head_size):
    """Pure-JAX reference mirroring the PyTorch forward (mask=None path)."""
    wq, bq, wk, bk, wv, bv = params
    B, S, E = key.shape

    def split(x):  # (B, S, H*D) -> (B, H, S, D)
        return x.reshape(B, S, num_heads, head_size).transpose(0, 2, 1, 3)

    q = split(query @ wq + bq)
    k = split(key @ wk + bk)
    v = split(value @ wv + bv)
    scores = jnp.einsum("bhqd,bhkd->bhqk", q, k) / (head_size ** 0.5)
    p = jax.nn.softmax(scores, axis=-1)
    out = jnp.einsum("bhqk,bhkd->bhqd", p, v)
    return out.transpose(0, 2, 1, 3).reshape(B, S, num_heads * head_size)


if __name__ == "__main__":
    B, S, E = 2, 8, 32
    num_heads, head_size = 4, 8
    HD = num_heads * head_size

    root = jax.random.PRNGKey(0)
    kk, kv, kq, k1, k2, k3, k4, k5, k6 = jax.random.split(root, 9)

    key_in = jax.random.normal(kk, (B, S, E), dtype=jnp.float32)
    value_in = jax.random.normal(kv, (B, S, E), dtype=jnp.float32)
    query_in = jax.random.normal(kq, (B, S, E), dtype=jnp.float32)

    # Deterministic nn.Linear-style init: U(-1/sqrt(E), 1/sqrt(E)).
    bound = 1.0 / (E ** 0.5)
    wq = jax.random.uniform(k1, (E, HD), jnp.float32, -bound, bound)
    bq = jax.random.uniform(k2, (1, HD), jnp.float32, -bound, bound)
    wk = jax.random.uniform(k3, (E, HD), jnp.float32, -bound, bound)
    bk = jax.random.uniform(k4, (1, HD), jnp.float32, -bound, bound)
    wv = jax.random.uniform(k5, (E, HD), jnp.float32, -bound, bound)
    bv = jax.random.uniform(k6, (1, HD), jnp.float32, -bound, bound)
    params = (wq, bq, wk, bk, wv, bv)

    ref = _reference(key_in, value_in, query_in, params, num_heads, head_size)

    # f32 path (v5e-friendly).  Tolerance 2e-3: the only deviation from the
    # exact f32 math is the EUP approximate reciprocal in the softmax
    # normalization (any real bug would be orders of magnitude larger).
    out = multi_head_attention(key_in, value_in, query_in, params,
                               num_heads=num_heads, head_size=head_size)
    out = jax.block_until_ready(out)
    assert out.shape == (B, S, HD), out.shape
    assert jnp.allclose(out, ref, atol=2e-3, rtol=2e-3), "f32 kernel mismatch vs reference"

    # bf16 MXU path (v6e/v7x feedback): bf16 operands, f32 accumulation,
    # f32 softmax.
    out_bf16 = multi_head_attention(key_in, value_in, query_in, params,
                                    num_heads=num_heads, head_size=head_size,
                                    compute_dtype=jnp.bfloat16)
    out_bf16 = jax.block_until_ready(out_bf16)
    assert jnp.allclose(out_bf16, ref, atol=5e-2, rtol=5e-2), "bf16 kernel mismatch vs reference"

    print("KERNEL_OK")
</pallas_src>

<mosaic_0001>
module attributes {stable_mosaic.version = 11 : i64} {
  func.func @_mha_kernel(%arg0: i32, %arg1: memref<2x8x32xf32, #tpu.memory_space<vmem>>, %arg2: memref<2x8x32xf32, #tpu.memory_space<vmem>>, %arg3: memref<2x8x32xf32, #tpu.memory_space<vmem>>, %arg4: memref<4x32x8xf32, #tpu.memory_space<vmem>>, %arg5: memref<4x1x8xf32, #tpu.memory_space<vmem>>, %arg6: memref<4x32x8xf32, #tpu.memory_space<vmem>>, %arg7: memref<4x1x8xf32, #tpu.memory_space<vmem>>, %arg8: memref<4x32x8xf32, #tpu.memory_space<vmem>>, %arg9: memref<4x1x8xf32, #tpu.memory_space<vmem>>, %arg10: memref<2x8x32xf32, #tpu.memory_space<vmem>>) attributes {dimension_semantics = [#tpu.dimension_semantics<parallel>], iteration_bounds = array<i64: 1>, scalar_prefetch = 0 : i64, scratch_operands = 0 : i64, tpu.core_type = #tpu.core_type<tc>, window_params = [{transform_indices = @transform_0, window_bounds = array<i64: 2, 8, 32>}, {transform_indices = @transform_1, window_bounds = array<i64: 2, 8, 32>}, {transform_indices = @transform_2, window_bounds = array<i64: 2, 8, 32>}, {pipeline_mode = #tpu.pipeline_mode<synchronous>, transform_indices = @transform_3, window_bounds = array<i64: 4, 32, 8>}, {pipeline_mode = #tpu.pipeline_mode<synchronous>, transform_indices = @transform_4, window_bounds = array<i64: 4, 1, 8>}, {pipeline_mode = #tpu.pipeline_mode<synchronous>, transform_indices = @transform_5, window_bounds = array<i64: 4, 32, 8>}, {pipeline_mode = #tpu.pipeline_mode<synchronous>, transform_indices = @transform_6, window_bounds = array<i64: 4, 1, 8>}, {pipeline_mode = #tpu.pipeline_mode<synchronous>, transform_indices = @transform_7, window_bounds = array<i64: 4, 32, 8>}, {pipeline_mode = #tpu.pipeline_mode<synchronous>, transform_indices = @transform_8, window_bounds = array<i64: 4, 1, 8>}, {transform_indices = @transform_9, window_bounds = array<i64: 2, 8, 32>}]} {
    %c0 = arith.constant 0 : index
    %c0_0 = arith.constant 0 : index
    %c0_1 = arith.constant 0 : index
    %0 = vector.load %arg3[%c0, %c0_0, %c0_1] : memref<2x8x32xf32, #tpu.memory_space<vmem>>, vector<2x8x32xf32>
    %1 = vector.shape_cast %0 : vector<2x8x32xf32> to vector<16x32xf32>
    %c0_2 = arith.constant 0 : index
    %c0_3 = arith.constant 0 : index
    %c0_4 = arith.constant 0 : index
    %2 = vector.load %arg1[%c0_2, %c0_3, %c0_4] : memref<2x8x32xf32, #tpu.memory_space<vmem>>, vector<2x8x32xf32>
    %3 = vector.shape_cast %2 : vector<2x8x32xf32> to vector<16x32xf32>
    %c0_5 = arith.constant 0 : index
    %c0_6 = arith.constant 0 : index
    %c0_7 = arith.constant 0 : index
    %4 = vector.load %arg2[%c0_5, %c0_6, %c0_7] : memref<2x8x32xf32, #tpu.memory_space<vmem>>, vector<2x8x32xf32>
    %5 = vector.shape_cast %4 : vector<2x8x32xf32> to vector<16x32xf32>
    %c0_8 = arith.constant 0 : index
    %c0_9 = arith.constant 0 : index
    %c0_10 = arith.constant 0 : index
    %6 = vector.load %arg4[%c0_8, %c0_9, %c0_10] : memref<4x32x8xf32, #tpu.memory_space<vmem>>, vector<1x32x8xf32>
    %7 = vector.shape_cast %6 : vector<1x32x8xf32> to vector<32x8xf32>
    %cst = arith.constant dense<0.000000e+00> : vector<16x8xf32>
    %8 = tpu.matmul %1, %7, %cst {dimension_numbers = #tpu.dot_dimension_numbers<[1], [0], [0], [1], [0, 0, 1, 1], [], []>} : vector<16x32xf32>, vector<32x8xf32>, vector<16x8xf32> -> vector<16x8xf32>
    %c0_11 = arith.constant 0 : index
    %c0_12 = arith.constant 0 : index
    %c0_13 = arith.constant 0 : index
    %9 = vector.load %arg5[%c0_11, %c0_12, %c0_13] : memref<4x1x8xf32, #tpu.memory_space<vmem>>, vector<1x1x8xf32>
    %10 = vector.shape_cast %9 : vector<1x1x8xf32> to vector<1x8xf32>
    %11 = vector.broadcast %10 : vector<1x8xf32> to vector<16x8xf32>
    %12 = arith.addf %8, %11 : vector<16x8xf32>
    %cst_14 = arith.constant 0.353553385 : f32
    %13 = vector.broadcast %cst_14 : f32 to vector<16x8xf32>
    %14 = arith.mulf %12, %13 : vector<16x8xf32>
    %15 = vector.shape_cast %14 : vector<16x8xf32> to vector<2x8x8xf32>
    %c0_15 = arith.constant 0 : index
    %c0_16 = arith.constant 0 : index
    %c0_17 = arith.constant 0 : index
    %16 = vector.load %arg6[%c0_15, %c0_16, %c0_17] : memref<4x32x8xf32, #tpu.memory_space<vmem>>, vector<1x32x8xf32>
    %17 = vector.shape_cast %16 : vector<1x32x8xf32> to vector<32x8xf32>
    %cst_18 = arith.constant dense<0.000000e+00> : vector<16x8xf32>
    %18 = tpu.matmul %3, %17, %cst_18 {dimension_numbers = #tpu.dot_dimension_numbers<[1], [0], [0], [1], [0, 0, 1, 1], [], []>} : vector<16x32xf32>, vector<32x8xf32>, vector<16x8xf32> -> vector<16x8xf32>
    %c0_19 = arith.constant 0 : index
    %c0_20 = arith.constant 0 : index
    %c0_21 = arith.constant 0 : index
    %19 = vector.load %arg7[%c0_19, %c0_20, %c0_21] : memref<4x1x8xf32, #tpu.memory_space<vmem>>, vector<1x1x8xf32>
    %20 = vector.shape_cast %19 : vector<1x1x8xf32> to vector<1x8xf32>
    %21 = vector.broadcast %20 : vector<1x8xf32> to vector<16x8xf32>
    %22 = arith.addf %18, %21 : vector<16x8xf32>
    %23 = vector.shape_cast %22 : vector<16x8xf32> to vector<2x8x8xf32>
    %c0_22 = arith.constant 0 : index
    %c0_23 = arith.constant 0 : index
    %c0_24 = arith.constant 0 : index
    %24 = vector.load %arg8[%c0_22, %c0_23, %c0_24] : memref<4x32x8xf32, #tpu.memory_space<vmem>>, vector<1x32x8xf32>
    %25 = vector.shape_cast %24 : vector<1x32x8xf32> to vector<32x8xf32>
    %cst_25 = arith.constant dense<0.000000e+00> : vector<16x8xf32>
    %26 = tpu.matmul %5, %25, %cst_25 {dimension_numbers = #tpu.dot_dimension_numbers<[1], [0], [0], [1], [0, 0, 1, 1], [], []>} : vector<16x32xf32>, vector<32x8xf32>, vector<16x8xf32> -> vector<16x8xf32>
    %c0_26 = arith.constant 0 : index
    %c0_27 = arith.constant 0 : index
    %c0_28 = arith.constant 0 : index
    %27 = vector.load %arg9[%c0_26, %c0_27, %c0_28] : memref<4x1x8xf32, #tpu.memory_space<vmem>>, vector<1x1x8xf32>
    %28 = vector.shape_cast %27 : vector<1x1x8xf32> to vector<1x8xf32>
    %29 = vector.broadcast %28 : vector<1x8xf32> to vector<16x8xf32>
    %30 = arith.addf %26, %29 : vector<16x8xf32>
    %31 = vector.shape_cast %30 : vector<16x8xf32> to vector<2x8x8xf32>
    "tpu.trace_start"() <{level = 10 : i32, message = "bqd,bkd->bqk"}> : () -> ()
    %cst_29 = arith.constant dense<0.000000e+00> : vector<2x8x8xf32>
    %32 = tpu.matmul %15, %23, %cst_29 {dimension_numbers = #tpu.dot_dimension_numbers<[2], [2], [1], [1], [0, 0, 0, 1, 1, 1], [0], [0]>} : vector<2x8x8xf32>, vector<2x8x8xf32>, vector<2x8x8xf32> -> vector<2x8x8xf32>
    "tpu.trace_stop"() : () -> ()
    %cst_30 = arith.constant dense<0xFF800000> : vector<2x8xf32>
    %33 = vector.multi_reduction <maximumf>, %32, %cst_30 [2] : vector<2x8x8xf32> to vector<2x8xf32>
    %34 = vector.shape_cast %33 : vector<2x8xf32> to vector<2x8x1xf32>
    %35 = vector.broadcast %34 : vector<2x8x1xf32> to vector<2x8x8xf32>
    %36 = arith.subf %32, %35 : vector<2x8x8xf32>
    %37 = math.exp %36 : vector<2x8x8xf32>
    %cst_31 = arith.constant dense<0.000000e+00> : vector<2x8xf32>
    %38 = vector.multi_reduction <add>, %37, %cst_31 [2] : vector<2x8x8xf32> to vector<2x8xf32>
    %39 = vector.shape_cast %38 : vector<2x8xf32> to vector<2x8x1xf32>
    %40 = tpu.reciprocal %39 {approx = true} : vector<2x8x1xf32> -> vector<2x8x1xf32>
    %41 = vector.broadcast %40 : vector<2x8x1xf32> to vector<2x8x8xf32>
    %42 = arith.mulf %37, %41 : vector<2x8x8xf32>
    "tpu.trace_start"() <{level = 10 : i32, message = "bqk,bkd->bqd"}> : () -> ()
    %cst_32 = arith.constant dense<0.000000e+00> : vector<2x8x8xf32>
    %43 = tpu.matmul %42, %31, %cst_32 {dimension_numbers = #tpu.dot_dimension_numbers<[2], [1], [1], [2], [0, 0, 0, 1, 1, 2], [0], [0]>} : vector<2x8x8xf32>, vector<2x8x8xf32>, vector<2x8x8xf32> -> vector<2x8x8xf32>
    "tpu.trace_stop"() : () -> ()
    %c1 = arith.constant 1 : index
    %c0_33 = arith.constant 0 : index
    %c0_34 = arith.constant 0 : index
    %44 = vector.load %arg4[%c1, %c0_33, %c0_34] : memref<4x32x8xf32, #tpu.memory_space<vmem>>, vector<1x32x8xf32>
    %45 = vector.shape_cast %44 : vector<1x32x8xf32> to vector<32x8xf32>
    %cst_35 = arith.constant dense<0.000000e+00> : vector<16x8xf32>
    %46 = tpu.matmul %1, %45, %cst_35 {dimension_numbers = #tpu.dot_dimension_numbers<[1], [0], [0], [1], [0, 0, 1, 1], [], []>} : vector<16x32xf32>, vector<32x8xf32>, vector<16x8xf32> -> vector<16x8xf32>
    %c1_36 = arith.constant 1 : index
    %c0_37 = arith.constant 0 : index
    %c0_38 = arith.constant 0 : index
    %47 = vector.load %arg5[%c1_36, %c0_37, %c0_38] : memref<4x1x8xf32, #tpu.memory_space<vmem>>, vector<1x1x8xf32>
    %48 = vector.shape_cast %47 : vector<1x1x8xf32> to vector<1x8xf32>
    %49 = vector.broadcast %48 : vector<1x8xf32> to vector<16x8xf32>
    %50 = arith.addf %46, %49 : vector<16x8xf32>
    %cst_39 = arith.constant 0.353553385 : f32
    %51 = vector.broadcast %cst_39 : f32 to vector<16x8xf32>
    %52 = arith.mulf %50, %51 : vector<16x8xf32>
    %53 = vector.shape_cast %52 : vector<16x8xf32> to vector<2x8x8xf32>
    %c1_40 = arith.constant 1 : index
    %c0_41 = arith.constant 0 : index
    %c0_42 = arith.constant 0 : index
    %54 = vector.load %arg6[%c1_40, %c0_41, %c0_42] : memref<4x32x8xf32, #tpu.memory_space<vmem>>, vector<1x32x8xf32>
    %55 = vector.shape_cast %54 : vector<1x32x8xf32> to vector<32x8xf32>
    %cst_43 = arith.constant dense<0.000000e+00> : vector<16x8xf32>
    %56 = tpu.matmul %3, %55, %cst_43 {dimension_numbers = #tpu.dot_dimension_numbers<[1], [0], [0], [1], [0, 0, 1, 1], [], []>} : vector<16x32xf32>, vector<32x8xf32>, vector<16x8xf32> -> vector<16x8xf32>
    %c1_44 = arith.constant 1 : index
    %c0_45 = arith.constant 0 : index
    %c0_46 = arith.constant 0 : index
    %57 = vector.load %arg7[%c1_44, %c0_45, %c0_46] : memref<4x1x8xf32, #tpu.memory_space<vmem>>, vector<1x1x8xf32>
    %58 = vector.shape_cast %57 : vector<1x1x8xf32> to vector<1x8xf32>
    %59 = vector.broadcast %58 : vector<1x8xf32> to vector<16x8xf32>
    %60 = arith.addf %56, %59 : vector<16x8xf32>
    %61 = vector.shape_cast %60 : vector<16x8xf32> to vector<2x8x8xf32>
    %c1_47 = arith.constant 1 : index
    %c0_48 = arith.constant 0 : index
    %c0_49 = arith.constant 0 : index
    %62 = vector.load %arg8[%c1_47, %c0_48, %c0_49] : memref<4x32x8xf32, #tpu.memory_space<vmem>>, vector<1x32x8xf32>
    %63 = vector.shape_cast %62 : vector<1x32x8xf32> to vector<32x8xf32>
    %cst_50 = arith.constant dense<0.000000e+00> : vector<16x8xf32>
    %64 = tpu.matmul %5, %63, %cst_50 {dimension_numbers = #tpu.dot_dimension_numbers<[1], [0], [0], [1], [0, 0, 1, 1], [], []>} : vector<16x32xf32>, vector<32x8xf32>, vector<16x8xf32> -> vector<16x8xf32>
    %c1_51 = arith.constant 1 : index
    %c0_52 = arith.constant 0 : index
    %c0_53 = arith.constant 0 : index
    %65 = vector.load %arg9[%c1_51, %c0_52, %c0_53] : memref<4x1x8xf32, #tpu.memory_space<vmem>>, vector<1x1x8xf32>
    %66 = vector.shape_cast %65 : vector<1x1x8xf32> to vector<1x8xf32>
    %67 = vector.broadcast %66 : vector<1x8xf32> to vector<16x8xf32>
    %68 = arith.addf %64, %67 : vector<16x8xf32>
    %69 = vector.shape_cast %68 : vector<16x8xf32> to vector<2x8x8xf32>
    "tpu.trace_start"() <{level = 10 : i32, message = "bqd,bkd->bqk"}> : () -> ()
    %cst_54 = arith.constant dense<0.000000e+00> : vector<2x8x8xf32>
    %70 = tpu.matmul %53, %61, %cst_54 {dimension_numbers = #tpu.dot_dimension_numbers<[2], [2], [1], [1], [0, 0, 0, 1, 1, 1], [0], [0]>} : vector<2x8x8xf32>, vector<2x8x8xf32>, vector<2x8x8xf32> -> vector<2x8x8xf32>
    "tpu.trace_stop"() : () -> ()
    %cst_55 = arith.constant dense<0xFF800000> : vector<2x8xf32>
    %71 = vector.multi_reduction <maximumf>, %70, %cst_55 [2] : vector<2x8x8xf32> to vector<2x8xf32>
    %72 = vector.shape_cast %71 : vector<2x8xf32> to vector<2x8x1xf32>
    %73 = vector.broadcast %72 : vector<2x8x1xf32> to vector<2x8x8xf32>
    %74 = arith.subf %70, %73 : vector<2x8x8xf32>
    %75 = math.exp %74 : vector<2x8x8xf32>
    %cst_56 = arith.constant dense<0.000000e+00> : vector<2x8xf32>
    %76 = vector.multi_reduction <add>, %75, %cst_56 [2] : vector<2x8x8xf32> to vector<2x8xf32>
    %77 = vector.shape_cast %76 : vector<2x8xf32> to vector<2x8x1xf32>
    %78 = tpu.reciprocal %77 {approx = true} : vector<2x8x1xf32> -> vector<2x8x1xf32>
    %79 = vector.broadcast %78 : vector<2x8x1xf32> to vector<2x8x8xf32>
    %80 = arith.mulf %75, %79 : vector<2x8x8xf32>
    "tpu.trace_start"() <{level = 10 : i32, message = "bqk,bkd->bqd"}> : () -> ()
    %cst_57 = arith.constant dense<0.000000e+00> : vector<2x8x8xf32>
    %81 = tpu.matmul %80, %69, %cst_57 {dimension_numbers = #tpu.dot_dimension_numbers<[2], [1], [1], [2], [0, 0, 0, 1, 1, 2], [0], [0]>} : vector<2x8x8xf32>, vector<2x8x8xf32>, vector<2x8x8xf32> -> vector<2x8x8xf32>
    "tpu.trace_stop"() : () -> ()
    %c2 = arith.constant 2 : index
    %c0_58 = arith.constant 0 : index
    %c0_59 = arith.constant 0 : index
    %82 = vector.load %arg4[%c2, %c0_58, %c0_59] : memref<4x32x8xf32, #tpu.memory_space<vmem>>, vector<1x32x8xf32>
    %83 = vector.shape_cast %82 : vector<1x32x8xf32> to vector<32x8xf32>
    %cst_60 = arith.constant dense<0.000000e+00> : vector<16x8xf32>
    %84 = tpu.matmul %1, %83, %cst_60 {dimension_numbers = #tpu.dot_dimension_numbers<[1], [0], [0], [1], [0, 0, 1, 1], [], []>} : vector<16x32xf32>, vector<32x8xf32>, vector<16x8xf32> -> vector<16x8xf32>
    %c2_61 = arith.constant 2 : index
    %c0_62 = arith.constant 0 : index
    %c0_63 = arith.constant 0 : index
    %85 = vector.load %arg5[%c2_61, %c0_62, %c0_63] : memref<4x1x8xf32, #tpu.memory_space<vmem>>, vector<1x1x8xf32>
    %86 = vector.shape_cast %85 : vector<1x1x8xf32> to vector<1x8xf32>
    %87 = vector.broadcast %86 : vector<1x8xf32> to vector<16x8xf32>
    %88 = arith.addf %84, %87 : vector<16x8xf32>
    %cst_64 = arith.constant 0.353553385 : f32
    %89 = vector.broadcast %cst_64 : f32 to vector<16x8xf32>
    %90 = arith.mulf %88, %89 : vector<16x8xf32>
    %91 = vector.shape_cast %90 : vector<16x8xf32> to vector<2x8x8xf32>
    %c2_65 = arith.constant 2 : index
    %c0_66 = arith.constant 0 : index
    %c0_67 = arith.constant 0 : index
    %92 = vector.load %arg6[%c2_65, %c0_66, %c0_67] : memref<4x32x8xf32, #tpu.memory_space<vmem>>, vector<1x32x8xf32>
    %93 = vector.shape_cast %92 : vector<1x32x8xf32> to vector<32x8xf32>
    %cst_68 = arith.constant dense<0.000000e+00> : vector<16x8xf32>
    %94 = tpu.matmul %3, %93, %cst_68 {dimension_numbers = #tpu.dot_dimension_numbers<[1], [0], [0], [1], [0, 0, 1, 1], [], []>} : vector<16x32xf32>, vector<32x8xf32>, vector<16x8xf32> -> vector<16x8xf32>
    %c2_69 = arith.constant 2 : index
    %c0_70 = arith.constant 0 : index
    %c0_71 = arith.constant 0 : index
    %95 = vector.load %arg7[%c2_69, %c0_70, %c0_71] : memref<4x1x8xf32, #tpu.memory_space<vmem>>, vector<1x1x8xf32>
    %96 = vector.shape_cast %95 : vector<1x1x8xf32> to vector<1x8xf32>
    %97 = vector.broadcast %96 : vector<1x8xf32> to vector<16x8xf32>
    %98 = arith.addf %94, %97 : vector<16x8xf32>
    %99 = vector.shape_cast %98 : vector<16x8xf32> to vector<2x8x8xf32>
    %c2_72 = arith.constant 2 : index
    %c0_73 = arith.constant 0 : index
    %c0_74 = arith.constant 0 : index
    %100 = vector.load %arg8[%c2_72, %c0_73, %c0_74] : memref<4x32x8xf32, #tpu.memory_space<vmem>>, vector<1x32x8xf32>
    %101 = vector.shape_cast %100 : vector<1x32x8xf32> to vector<32x8xf32>
    %cst_75 = arith.constant dense<0.000000e+00> : vector<16x8xf32>
    %102 = tpu.matmul %5, %101, %cst_75 {dimension_numbers = #tpu.dot_dimension_numbers<[1], [0], [0], [1], [0, 0, 1, 1], [], []>} : vector<16x32xf32>, vector<32x8xf32>, vector<16x8xf32> -> vector<16x8xf32>
    %c2_76 = arith.constant 2 : index
    %c0_77 = arith.constant 0 : index
    %c0_78 = arith.constant 0 : index
    %103 = vector.load %arg9[%c2_76, %c0_77, %c0_78] : memref<4x1x8xf32, #tpu.memory_space<vmem>>, vector<1x1x8xf32>
    %104 = vector.shape_cast %103 : vector<1x1x8xf32> to vector<1x8xf32>
    %105 = vector.broadcast %104 : vector<1x8xf32> to vector<16x8xf32>
    %106 = arith.addf %102, %105 : vector<16x8xf32>
    %107 = vector.shape_cast %106 : vector<16x8xf32> to vector<2x8x8xf32>
    "tpu.trace_start"() <{level = 10 : i32, message = "bqd,bkd->bqk"}> : () -> ()
    %cst_79 = arith.constant dense<0.000000e+00> : vector<2x8x8xf32>
    %108 = tpu.matmul %91, %99, %cst_79 {dimension_numbers = #tpu.dot_dimension_numbers<[2], [2], [1], [1], [0, 0, 0, 1, 1, 1], [0], [0]>} : vector<2x8x8xf32>, vector<2x8x8xf32>, vector<2x8x8xf32> -> vector<2x8x8xf32>
    "tpu.trace_stop"() : () -> ()
    %cst_80 = arith.constant dense<0xFF800000> : vector<2x8xf32>
    %109 = vector.multi_reduction <maximumf>, %108, %cst_80 [2] : vector<2x8x8xf32> to vector<2x8xf32>
    %110 = vector.shape_cast %109 : vector<2x8xf32> to vector<2x8x1xf32>
    %111 = vector.broadcast %110 : vector<2x8x1xf32> to vector<2x8x8xf32>
    %112 = arith.subf %108, %111 : vector<2x8x8xf32>
    %113 = math.exp %112 : vector<2x8x8xf32>
    %cst_81 = arith.constant dense<0.000000e+00> : vector<2x8xf32>
    %114 = vector.multi_reduction <add>, %113, %cst_81 [2] : vector<2x8x8xf32> to vector<2x8xf32>
    %115 = vector.shape_cast %114 : vector<2x8xf32> to vector<2x8x1xf32>
    %116 = tpu.reciprocal %115 {approx = true} : vector<2x8x1xf32> -> vector<2x8x1xf32>
    %117 = vector.broadcast %116 : vector<2x8x1xf32> to vector<2x8x8xf32>
    %118 = arith.mulf %113, %117 : vector<2x8x8xf32>
    "tpu.trace_start"() <{level = 10 : i32, message = "bqk,bkd->bqd"}> : () -> ()
    %cst_82 = arith.constant dense<0.000000e+00> : vector<2x8x8xf32>
    %119 = tpu.matmul %118, %107, %cst_82 {dimension_numbers = #tpu.dot_dimension_numbers<[2], [1], [1], [2], [0, 0, 0, 1, 1, 2], [0], [0]>} : vector<2x8x8xf32>, vector<2x8x8xf32>, vector<2x8x8xf32> -> vector<2x8x8xf32>
    "tpu.trace_stop"() : () -> ()
    %c3 = arith.constant 3 : index
    %c0_83 = arith.constant 0 : index
    %c0_84 = arith.constant 0 : index
    %120 = vector.load %arg4[%c3, %c0_83, %c0_84] : memref<4x32x8xf32, #tpu.memory_space<vmem>>, vector<1x32x8xf32>
    %121 = vector.shape_cast %120 : vector<1x32x8xf32> to vector<32x8xf32>
    %cst_85 = arith.constant dense<0.000000e+00> : vector<16x8xf32>
    %122 = tpu.matmul %1, %121, %cst_85 {dimension_numbers = #tpu.dot_dimension_numbers<[1], [0], [0], [1], [0, 0, 1, 1], [], []>} : vector<16x32xf32>, vector<32x8xf32>, vector<16x8xf32> -> vector<16x8xf32>
    %c3_86 = arith.constant 3 : index
    %c0_87 = arith.constant 0 : index
    %c0_88 = arith.constant 0 : index
    %123 = vector.load %arg5[%c3_86, %c0_87, %c0_88] : memref<4x1x8xf32, #tpu.memory_space<vmem>>, vector<1x1x8xf32>
    %124 = vector.shape_cast %123 : vector<1x1x8xf32> to vector<1x8xf32>
    %125 = vector.broadcast %124 : vector<1x8xf32> to vector<16x8xf32>
    %126 = arith.addf %122, %125 : vector<16x8xf32>
    %cst_89 = arith.constant 0.353553385 : f32
    %127 = vector.broadcast %cst_89 : f32 to vector<16x8xf32>
    %128 = arith.mulf %126, %127 : vector<16x8xf32>
    %129 = vector.shape_cast %128 : vector<16x8xf32> to vector<2x8x8xf32>
    %c3_90 = arith.constant 3 : index
    %c0_91 = arith.constant 0 : index
    %c0_92 = arith.constant 0 : index
    %130 = vector.load %arg6[%c3_90, %c0_91, %c0_92] : memref<4x32x8xf32, #tpu.memory_space<vmem>>, vector<1x32x8xf32>
    %131 = vector.shape_cast %130 : vector<1x32x8xf32> to vector<32x8xf32>
    %cst_93 = arith.constant dense<0.000000e+00> : vector<16x8xf32>
    %132 = tpu.matmul %3, %131, %cst_93 {dimension_numbers = #tpu.dot_dimension_numbers<[1], [0], [0], [1], [0, 0, 1, 1], [], []>} : vector<16x32xf32>, vector<32x8xf32>, vector<16x8xf32> -> vector<16x8xf32>
    %c3_94 = arith.constant 3 : index
    %c0_95 = arith.constant 0 : index
    %c0_96 = arith.constant 0 : index
    %133 = vector.load %arg7[%c3_94, %c0_95, %c0_96] : memref<4x1x8xf32, #tpu.memory_space<vmem>>, vector<1x1x8xf32>
    %134 = vector.shape_cast %133 : vector<1x1x8xf32> to vector<1x8xf32>
    %135 = vector.broadcast %134 : vector<1x8xf32> to vector<16x8xf32>
    %136 = arith.addf %132, %135 : vector<16x8xf32>
    %137 = vector.shape_cast %136 : vector<16x8xf32> to vector<2x8x8xf32>
    %c3_97 = arith.constant 3 : index
    %c0_98 = arith.constant 0 : index
    %c0_99 = arith.constant 0 : index
    %138 = vector.load %arg8[%c3_97, %c0_98, %c0_99] : memref<4x32x8xf32, #tpu.memory_space<vmem>>, vector<1x32x8xf32>
    %139 = vector.shape_cast %138 : vector<1x32x8xf32> to vector<32x8xf32>
    %cst_100 = arith.constant dense<0.000000e+00> : vector<16x8xf32>
    %140 = tpu.matmul %5, %139, %cst_100 {dimension_numbers = #tpu.dot_dimension_numbers<[1], [0], [0], [1], [0, 0, 1, 1], [], []>} : vector<16x32xf32>, vector<32x8xf32>, vector<16x8xf32> -> vector<16x8xf32>
    %c3_101 = arith.constant 3 : index
    %c0_102 = arith.constant 0 : index
    %c0_103 = arith.constant 0 : index
    %141 = vector.load %arg9[%c3_101, %c0_102, %c0_103] : memref<4x1x8xf32, #tpu.memory_space<vmem>>, vector<1x1x8xf32>
    %142 = vector.shape_cast %141 : vector<1x1x8xf32> to vector<1x8xf32>
    %143 = vector.broadcast %142 : vector<1x8xf32> to vector<16x8xf32>
    %144 = arith.addf %140, %143 : vector<16x8xf32>
    %145 = vector.shape_cast %144 : vector<16x8xf32> to vector<2x8x8xf32>
    "tpu.trace_start"() <{level = 10 : i32, message = "bqd,bkd->bqk"}> : () -> ()
    %cst_104 = arith.constant dense<0.000000e+00> : vector<2x8x8xf32>
    %146 = tpu.matmul %129, %137, %cst_104 {dimension_numbers = #tpu.dot_dimension_numbers<[2], [2], [1], [1], [0, 0, 0, 1, 1, 1], [0], [0]>} : vector<2x8x8xf32>, vector<2x8x8xf32>, vector<2x8x8xf32> -> vector<2x8x8xf32>
    "tpu.trace_stop"() : () -> ()
    %cst_105 = arith.constant dense<0xFF800000> : vector<2x8xf32>
    %147 = vector.multi_reduction <maximumf>, %146, %cst_105 [2] : vector<2x8x8xf32> to vector<2x8xf32>
    %148 = vector.shape_cast %147 : vector<2x8xf32> to vector<2x8x1xf32>
    %149 = vector.broadcast %148 : vector<2x8x1xf32> to vector<2x8x8xf32>
    %150 = arith.subf %146, %149 : vector<2x8x8xf32>
    %151 = math.exp %150 : vector<2x8x8xf32>
    %cst_106 = arith.constant dense<0.000000e+00> : vector<2x8xf32>
    %152 = vector.multi_reduction <add>, %151, %cst_106 [2] : vector<2x8x8xf32> to vector<2x8xf32>
    %153 = vector.shape_cast %152 : vector<2x8xf32> to vector<2x8x1xf32>
    %154 = tpu.reciprocal %153 {approx = true} : vector<2x8x1xf32> -> vector<2x8x1xf32>
    %155 = vector.broadcast %154 : vector<2x8x1xf32> to vector<2x8x8xf32>
    %156 = arith.mulf %151, %155 : vector<2x8x8xf32>
    "tpu.trace_start"() <{level = 10 : i32, message = "bqk,bkd->bqd"}> : () -> ()
    %cst_107 = arith.constant dense<0.000000e+00> : vector<2x8x8xf32>
    %157 = tpu.matmul %156, %145, %cst_107 {dimension_numbers = #tpu.dot_dimension_numbers<[2], [1], [1], [2], [0, 0, 0, 1, 1, 2], [0], [0]>} : vector<2x8x8xf32>, vector<2x8x8xf32>, vector<2x8x8xf32> -> vector<2x8x8xf32>
    "tpu.trace_stop"() : () -> ()
    %158 = tpu.concatenate %43, %81, %119, %157 in 2 : vector<2x8x8xf32>, vector<2x8x8xf32>, vector<2x8x8xf32>, vector<2x8x8xf32> -> vector<2x8x32xf32>
    %c0_108 = arith.constant 0 : index
    %c0_109 = arith.constant 0 : index
    %c0_110 = arith.constant 0 : index
    %159 = vector.load %arg10[%c0_108, %c0_109, %c0_110] : memref<2x8x32xf32, #tpu.memory_space<vmem>>, vector<2x8x32xf32>
    tpu.vector_store %arg10[%c0_108, %c0_109, %c0_110], %158 {strides = array<i32>} : memref<2x8x32xf32, #tpu.memory_space<vmem>>, vector<2x8x32xf32>,
    return
  }
  func.func @transform_0(%arg0: i32) -> (i32, i32, i32) {
    %c0_i32 = arith.constant 0 : i32
    %c0_i32_0 = arith.constant 0 : i32
    %c0_i32_1 = arith.constant 0 : i32
    return %arg0, %c0_i32, %c0_i32_0 : i32, i32, i32
  }
  func.func @transform_1(%arg0: i32) -> (i32, i32, i32) {
    %c0_i32 = arith.constant 0 : i32
    %c0_i32_0 = arith.constant 0 : i32
    %c0_i32_1 = arith.constant 0 : i32
    return %arg0, %c0_i32, %c0_i32_0 : i32, i32, i32
  }
  func.func @transform_2(%arg0: i32) -> (i32, i32, i32) {
    %c0_i32 = arith.constant 0 : i32
    %c0_i32_0 = arith.constant 0 : i32
    %c0_i32_1 = arith.constant 0 : i32
    return %arg0, %c0_i32, %c0_i32_0 : i32, i32, i32
  }
  func.func @transform_3(%arg0: i32) -> (i32, i32, i32) {
    %c0_i32 = arith.constant 0 : i32
    %c0_i32_0 = arith.constant 0 : i32
    %c0_i32_1 = arith.constant 0 : i32
    %c0_i32_2 = arith.constant 0 : i32
    return %c0_i32, %c0_i32_0, %c0_i32_1 : i32, i32, i32
  }
  func.func @transform_4(%arg0: i32) -> (i32, i32, i32) {
    %c0_i32 = arith.constant 0 : i32
    %c0_i32_0 = arith.constant 0 : i32
    %c0_i32_1 = arith.constant 0 : i32
    %c0_i32_2 = arith.constant 0 : i32
    return %c0_i32, %c0_i32_0, %c0_i32_1 : i32, i32, i32
  }
  func.func @transform_5(%arg0: i32) -> (i32, i32, i32) {
    %c0_i32 = arith.constant 0 : i32
    %c0_i32_0 = arith.constant 0 : i32
    %c0_i32_1 = arith.constant 0 : i32
    %c0_i32_2 = arith.constant 0 : i32
    return %c0_i32, %c0_i32_0, %c0_i32_1 : i32, i32, i32
  }
  func.func @transform_6(%arg0: i32) -> (i32, i32, i32) {
    %c0_i32 = arith.constant 0 : i32
    %c0_i32_0 = arith.constant 0 : i32
    %c0_i32_1 = arith.constant 0 : i32
    %c0_i32_2 = arith.constant 0 : i32
    return %c0_i32, %c0_i32_0, %c0_i32_1 : i32, i32, i32
  }
  func.func @transform_7(%arg0: i32) -> (i32, i32, i32) {
    %c0_i32 = arith.constant 0 : i32
    %c0_i32_0 = arith.constant 0 : i32
    %c0_i32_1 = arith.constant 0 : i32
    %c0_i32_2 = arith.constant 0 : i32
    return %c0_i32, %c0_i32_0, %c0_i32_1 : i32, i32, i32
  }
  func.func @transform_8(%arg0: i32) -> (i32, i32, i32) {
    %c0_i32 = arith.constant 0 : i32
    %c0_i32_0 = arith.constant 0 : i32
    %c0_i32_1 = arith.constant 0 : i32
    %c0_i32_2 = arith.constant 0 : i32
    return %c0_i32, %c0_i32_0, %c0_i32_1 : i32, i32, i32
  }
  func.func @transform_9(%arg0: i32) -> (i32, i32, i32) {
    %c0_i32 = arith.constant 0 : i32
    %c0_i32_0 = arith.constant 0 : i32
    %c0_i32_1 = arith.constant 0 : i32
    return %arg0, %c0_i32, %c0_i32_0 : i32, i32, i32
  }
}

module attributes {stable_mosaic.version = 11 : i64} {
  func.func @_mha_kernel(%arg0: i32, %arg1: memref<2x8x32xf32, #tpu.memory_space<vmem>>, %arg2: memref<2x8x32xf32, #tpu.memory_space<vmem>>, %arg3: memref<2x8x32xf32, #tpu.memory_space<vmem>>, %arg4: memref<4x32x8xf32, #tpu.memory_space<vmem>>, %arg5: memref<4x1x8xf32, #tpu.memory_space<vmem>>, %arg6: memref<4x32x8xf32, #tpu.memory_space<vmem>>, %arg7: memref<4x1x8xf32, #tpu.memory_space<vmem>>, %arg8: memref<4x32x8xf32, #tpu.memory_space<vmem>>, %arg9: memref<4x1x8xf32, #tpu.memory_space<vmem>>, %arg10: memref<2x8x32xf32, #tpu.memory_space<vmem>>) attributes {dimension_semantics = [#tpu.dimension_semantics<parallel>], iteration_bounds = array<i64: 1>, scalar_prefetch = 0 : i64, scratch_operands = 0 : i64, tpu.core_type = #tpu.core_type<tc>, window_params = [{transform_indices = @transform_0, window_bounds = array<i64: 2, 8, 32>}, {transform_indices = @transform_1, window_bounds = array<i64: 2, 8, 32>}, {transform_indices = @transform_2, window_bounds = array<i64: 2, 8, 32>}, {pipeline_mode = #tpu.pipeline_mode<synchronous>, transform_indices = @transform_3, window_bounds = array<i64: 4, 32, 8>}, {pipeline_mode = #tpu.pipeline_mode<synchronous>, transform_indices = @transform_4, window_bounds = array<i64: 4, 1, 8>}, {pipeline_mode = #tpu.pipeline_mode<synchronous>, transform_indices = @transform_5, window_bounds = array<i64: 4, 32, 8>}, {pipeline_mode = #tpu.pipeline_mode<synchronous>, transform_indices = @transform_6, window_bounds = array<i64: 4, 1, 8>}, {pipeline_mode = #tpu.pipeline_mode<synchronous>, transform_indices = @transform_7, window_bounds = array<i64: 4, 32, 8>}, {pipeline_mode = #tpu.pipeline_mode<synchronous>, transform_indices = @transform_8, window_bounds = array<i64: 4, 1, 8>}, {transform_indices = @transform_9, window_bounds = array<i64: 2, 8, 32>}]} {
    %c0 = arith.constant 0 : index
    %c0_0 = arith.constant 0 : index
    %c0_1 = arith.constant 0 : index
    %0 = vector.load %arg3[%c0, %c0_0, %c0_1] : memref<2x8x32xf32, #tpu.memory_space<vmem>>, vector<2x8x32xf32>
    %1 = vector.shape_cast %0 : vector<2x8x32xf32> to vector<16x32xf32>
    %c0_2 = arith.constant 0 : index
    %c0_3 = arith.constant 0 : index
    %c0_4 = arith.constant 0 : index
    %2 = vector.load %arg1[%c0_2, %c0_3, %c0_4] : memref<2x8x32xf32, #tpu.memory_space<vmem>>, vector<2x8x32xf32>
    %3 = vector.shape_cast %2 : vector<2x8x32xf32> to vector<16x32xf32>
    %c0_5 = arith.constant 0 : index
    %c0_6 = arith.constant 0 : index
    %c0_7 = arith.constant 0 : index
    %4 = vector.load %arg2[%c0_5, %c0_6, %c0_7] : memref<2x8x32xf32, #tpu.memory_space<vmem>>, vector<2x8x32xf32>
    %5 = vector.shape_cast %4 : vector<2x8x32xf32> to vector<16x32xf32>
    %c0_8 = arith.constant 0 : index
    %c0_9 = arith.constant 0 : index
    %c0_10 = arith.constant 0 : index
    %6 = vector.load %arg4[%c0_8, %c0_9, %c0_10] : memref<4x32x8xf32, #tpu.memory_space<vmem>>, vector<1x32x8xf32>
    %7 = vector.shape_cast %6 : vector<1x32x8xf32> to vector<32x8xf32>
    %cst = arith.constant dense<0.000000e+00> : vector<16x8xf32>
    %8 = tpu.matmul %1, %7, %cst {dimension_numbers = #tpu.dot_dimension_numbers<[1], [0], [0], [1], [0, 0, 1, 1], [], []>} : vector<16x32xf32>, vector<32x8xf32>, vector<16x8xf32> -> vector<16x8xf32>
    %c0_11 = arith.constant 0 : index
    %c0_12 = arith.constant 0 : index
    %c0_13 = arith.constant 0 : index
    %9 = vector.load %arg5[%c0_11, %c0_12, %c0_13] : memref<4x1x8xf32, #tpu.memory_space<vmem>>, vector<1x1x8xf32>
    %10 = vector.shape_cast %9 : vector<1x1x8xf32> to vector<1x8xf32>
    %11 = vector.broadcast %10 : vector<1x8xf32> to vector<16x8xf32>
    %12 = arith.addf %8, %11 : vector<16x8xf32>
    %cst_14 = arith.constant 0.353553385 : f32
    %13 = vector.broadcast %cst_14 : f32 to vector<16x8xf32>
    %14 = arith.mulf %12, %13 : vector<16x8xf32>
    %15 = vector.shape_cast %14 : vector<16x8xf32> to vector<2x8x8xf32>
    %c0_15 = arith.constant 0 : index
    %c0_16 = arith.constant 0 : index
    %c0_17 = arith.constant 0 : index
    %16 = vector.load %arg6[%c0_15, %c0_16, %c0_17] : memref<4x32x8xf32, #tpu.memory_space<vmem>>, vector<1x32x8xf32>
    %17 = vector.shape_cast %16 : vector<1x32x8xf32> to vector<32x8xf32>
    %cst_18 = arith.constant dense<0.000000e+00> : vector<16x8xf32>
    %18 = tpu.matmul %3, %17, %cst_18 {dimension_numbers = #tpu.dot_dimension_numbers<[1], [0], [0], [1], [0, 0, 1, 1], [], []>} : vector<16x32xf32>, vector<32x8xf32>, vector<16x8xf32> -> vector<16x8xf32>
    %c0_19 = arith.constant 0 : index
    %c0_20 = arith.constant 0 : index
    %c0_21 = arith.constant 0 : index
    %19 = vector.load %arg7[%c0_19, %c0_20, %c0_21] : memref<4x1x8xf32, #tpu.memory_space<vmem>>, vector<1x1x8xf32>
    %20 = vector.shape_cast %19 : vector<1x1x8xf32> to vector<1x8xf32>
    %21 = vector.broadcast %20 : vector<1x8xf32> to vector<16x8xf32>
    %22 = arith.addf %18, %21 : vector<16x8xf32>
    %23 = vector.shape_cast %22 : vector<16x8xf32> to vector<2x8x8xf32>
    %c0_22 = arith.constant 0 : index
    %c0_23 = arith.constant 0 : index
    %c0_24 = arith.constant 0 : index
    %24 = vector.load %arg8[%c0_22, %c0_23, %c0_24] : memref<4x32x8xf32, #tpu.memory_space<vmem>>, vector<1x32x8xf32>
    %25 = vector.shape_cast %24 : vector<1x32x8xf32> to vector<32x8xf32>
    %cst_25 = arith.constant dense<0.000000e+00> : vector<16x8xf32>
    %26 = tpu.matmul %5, %25, %cst_25 {dimension_numbers = #tpu.dot_dimension_numbers<[1], [0], [0], [1], [0, 0, 1, 1], [], []>} : vector<16x32xf32>, vector<32x8xf32>, vector<16x8xf32> -> vector<16x8xf32>
    %c0_26 = arith.constant 0 : index
    %c0_27 = arith.constant 0 : index
    %c0_28 = arith.constant 0 : index
    %27 = vector.load %arg9[%c0_26, %c0_27, %c0_28] : memref<4x1x8xf32, #tpu.memory_space<vmem>>, vector<1x1x8xf32>
    %28 = vector.shape_cast %27 : vector<1x1x8xf32> to vector<1x8xf32>
    %29 = vector.broadcast %28 : vector<1x8xf32> to vector<16x8xf32>
    %30 = arith.addf %26, %29 : vector<16x8xf32>
    %31 = vector.shape_cast %30 : vector<16x8xf32> to vector<2x8x8xf32>
    "tpu.trace_start"() <{level = 10 : i32, message = "bqd,bkd->bqk"}> : () -> ()
    %cst_29 = arith.constant dense<0.000000e+00> : vector<2x8x8xf32>
    %32 = tpu.matmul %15, %23, %cst_29 {dimension_numbers = #tpu.dot_dimension_numbers<[2], [2], [1], [1], [0, 0, 0, 1, 1, 1], [0], [0]>} : vector<2x8x8xf32>, vector<2x8x8xf32>, vector<2x8x8xf32> -> vector<2x8x8xf32>
    "tpu.trace_stop"() : () -> ()
    %cst_30 = arith.constant dense<0xFF800000> : vector<2x8xf32>
    %33 = vector.multi_reduction <maximumf>, %32, %cst_30 [2] : vector<2x8x8xf32> to vector<2x8xf32>
    %34 = vector.shape_cast %33 : vector<2x8xf32> to vector<2x8x1xf32>
    %35 = vector.broadcast %34 : vector<2x8x1xf32> to vector<2x8x8xf32>
    %36 = arith.subf %32, %35 : vector<2x8x8xf32>
    %37 = math.exp %36 : vector<2x8x8xf32>
    %cst_31 = arith.constant dense<0.000000e+00> : vector<2x8xf32>
    %38 = vector.multi_reduction <add>, %37, %cst_31 [2] : vector<2x8x8xf32> to vector<2x8xf32>
    %39 = vector.shape_cast %38 : vector<2x8xf32> to vector<2x8x1xf32>
    %40 = tpu.reciprocal %39 {approx = true} : vector<2x8x1xf32> -> vector<2x8x1xf32>
    %41 = vector.broadcast %40 : vector<2x8x1xf32> to vector<2x8x8xf32>
    %42 = arith.mulf %37, %41 : vector<2x8x8xf32>
    "tpu.trace_start"() <{level = 10 : i32, message = "bqk,bkd->bqd"}> : () -> ()
    %cst_32 = arith.constant dense<0.000000e+00> : vector<2x8x8xf32>
    %43 = tpu.matmul %42, %31, %cst_32 {dimension_numbers = #tpu.dot_dimension_numbers<[2], [1], [1], [2], [0, 0, 0, 1, 1, 2], [0], [0]>} : vector<2x8x8xf32>, vector<2x8x8xf32>, vector<2x8x8xf32> -> vector<2x8x8xf32>
    "tpu.trace_stop"() : () -> ()
    %c1 = arith.constant 1 : index
    %c0_33 = arith.constant 0 : index
    %c0_34 = arith.constant 0 : index
    %44 = vector.load %arg4[%c1, %c0_33, %c0_34] : memref<4x32x8xf32, #tpu.memory_space<vmem>>, vector<1x32x8xf32>
    %45 = vector.shape_cast %44 : vector<1x32x8xf32> to vector<32x8xf32>
    %cst_35 = arith.constant dense<0.000000e+00> : vector<16x8xf32>
    %46 = tpu.matmul %1, %45, %cst_35 {dimension_numbers = #tpu.dot_dimension_numbers<[1], [0], [0], [1], [0, 0, 1, 1], [], []>} : vector<16x32xf32>, vector<32x8xf32>, vector<16x8xf32> -> vector<16x8xf32>
    %c1_36 = arith.constant 1 : index
    %c0_37 = arith.constant 0 : index
    %c0_38 = arith.constant 0 : index
    %47 = vector.load %arg5[%c1_36, %c0_37, %c0_38] : memref<4x1x8xf32, #tpu.memory_space<vmem>>, vector<1x1x8xf32>
    %48 = vector.shape_cast %47 : vector<1x1x8xf32> to vector<1x8xf32>
    %49 = vector.broadcast %48 : vector<1x8xf32> to vector<16x8xf32>
    %50 = arith.addf %46, %49 : vector<16x8xf32>
    %cst_39 = arith.constant 0.353553385 : f32
    %51 = vector.broadcast %cst_39 : f32 to vector<16x8xf32>
    %52 = arith.mulf %50, %51 : vector<16x8xf32>
    %53 = vector.shape_cast %52 : vector<16x8xf32> to vector<2x8x8xf32>
    %c1_40 = arith.constant 1 : index
    %c0_41 = arith.constant 0 : index
    %c0_42 = arith.constant 0 : index
    %54 = vector.load %arg6[%c1_40, %c0_41, %c0_42] : memref<4x32x8xf32, #tpu.memory_space<vmem>>, vector<1x32x8xf32>
    %55 = vector.shape_cast %54 : vector<1x32x8xf32> to vector<32x8xf32>
    %cst_43 = arith.constant dense<0.000000e+00> : vector<16x8xf32>
    %56 = tpu.matmul %3, %55, %cst_43 {dimension_numbers = #tpu.dot_dimension_numbers<[1], [0], [0], [1], [0, 0, 1, 1], [], []>} : vector<16x32xf32>, vector<32x8xf32>, vector<16x8xf32> -> vector<16x8xf32>
    %c1_44 = arith.constant 1 : index
    %c0_45 = arith.constant 0 : index
    %c0_46 = arith.constant 0 : index
    %57 = vector.load %arg7[%c1_44, %c0_45, %c0_46] : memref<4x1x8xf32, #tpu.memory_space<vmem>>, vector<1x1x8xf32>
    %58 = vector.shape_cast %57 : vector<1x1x8xf32> to vector<1x8xf32>
    %59 = vector.broadcast %58 : vector<1x8xf32> to vector<16x8xf32>
    %60 = arith.addf %56, %59 : vector<16x8xf32>
    %61 = vector.shape_cast %60 : vector<16x8xf32> to vector<2x8x8xf32>
    %c1_47 = arith.constant 1 : index
    %c0_48 = arith.constant 0 : index
    %c0_49 = arith.constant 0 : index
    %62 = vector.load %arg8[%c1_47, %c0_48, %c0_49] : memref<4x32x8xf32, #tpu.memory_space<vmem>>, vector<1x32x8xf32>
    %63 = vector.shape_cast %62 : vector<1x32x8xf32> to vector<32x8xf32>
    %cst_50 = arith.constant dense<0.000000e+00> : vector<16x8xf32>
    %64 = tpu.matmul %5, %63, %cst_50 {dimension_numbers = #tpu.dot_dimension_numbers<[1], [0], [0], [1], [0, 0, 1, 1], [], []>} : vector<16x32xf32>, vector<32x8xf32>, vector<16x8xf32> -> vector<16x8xf32>
    %c1_51 = arith.constant 1 : index
    %c0_52 = arith.constant 0 : index
    %c0_53 = arith.constant 0 : index
    %65 = vector.load %arg9[%c1_51, %c0_52, %c0_53] : memref<4x1x8xf32, #tpu.memory_space<vmem>>, vector<1x1x8xf32>
    %66 = vector.shape_cast %65 : vector<1x1x8xf32> to vector<1x8xf32>
    %67 = vector.broadcast %66 : vector<1x8xf32> to vector<16x8xf32>
    %68 = arith.addf %64, %67 : vector<16x8xf32>
    %69 = vector.shape_cast %68 : vector<16x8xf32> to vector<2x8x8xf32>
    "tpu.trace_start"() <{level = 10 : i32, message = "bqd,bkd->bqk"}> : () -> ()
    %cst_54 = arith.constant dense<0.000000e+00> : vector<2x8x8xf32>
    %70 = tpu.matmul %53, %61, %cst_54 {dimension_numbers = #tpu.dot_dimension_numbers<[2], [2], [1], [1], [0, 0, 0, 1, 1, 1], [0], [0]>} : vector<2x8x8xf32>, vector<2x8x8xf32>, vector<2x8x8xf32> -> vector<2x8x8xf32>
    "tpu.trace_stop"() : () -> ()
    %cst_55 = arith.constant dense<0xFF800000> : vector<2x8xf32>
    %71 = vector.multi_reduction <maximumf>, %70, %cst_55 [2] : vector<2x8x8xf32> to vector<2x8xf32>
    %72 = vector.shape_cast %71 : vector<2x8xf32> to vector<2x8x1xf32>
    %73 = vector.broadcast %72 : vector<2x8x1xf32> to vector<2x8x8xf32>
    %74 = arith.subf %70, %73 : vector<2x8x8xf32>
    %75 = math.exp %74 : vector<2x8x8xf32>
    %cst_56 = arith.constant dense<0.000000e+00> : vector<2x8xf32>
    %76 = vector.multi_reduction <add>, %75, %cst_56 [2] : vector<2x8x8xf32> to vector<2x8xf32>
    %77 = vector.shape_cast %76 : vector<2x8xf32> to vector<2x8x1xf32>
    %78 = tpu.reciprocal %77 {approx = true} : vector<2x8x1xf32> -> vector<2x8x1xf32>
    %79 = vector.broadcast %78 : vector<2x8x1xf32> to vector<2x8x8xf32>
    %80 = arith.mulf %75, %79 : vector<2x8x8xf32>
    "tpu.trace_start"() <{level = 10 : i32, message = "bqk,bkd->bqd"}> : () -> ()
    %cst_57 = arith.constant dense<0.000000e+00> : vector<2x8x8xf32>
    %81 = tpu.matmul %80, %69, %cst_57 {dimension_numbers = #tpu.dot_dimension_numbers<[2], [1], [1], [2], [0, 0, 0, 1, 1, 2], [0], [0]>} : vector<2x8x8xf32>, vector<2x8x8xf32>, vector<2x8x8xf32> -> vector<2x8x8xf32>
    "tpu.trace_stop"() : () -> ()
    %c2 = arith.constant 2 : index
    %c0_58 = arith.constant 0 : index
    %c0_59 = arith.constant 0 : index
    %82 = vector.load %arg4[%c2, %c0_58, %c0_59] : memref<4x32x8xf32, #tpu.memory_space<vmem>>, vector<1x32x8xf32>
    %83 = vector.shape_cast %82 : vector<1x32x8xf32> to vector<32x8xf32>
    %cst_60 = arith.constant dense<0.000000e+00> : vector<16x8xf32>
    %84 = tpu.matmul %1, %83, %cst_60 {dimension_numbers = #tpu.dot_dimension_numbers<[1], [0], [0], [1], [0, 0, 1, 1], [], []>} : vector<16x32xf32>, vector<32x8xf32>, vector<16x8xf32> -> vector<16x8xf32>
    %c2_61 = arith.constant 2 : index
    %c0_62 = arith.constant 0 : index
    %c0_63 = arith.constant 0 : index
    %85 = vector.load %arg5[%c2_61, %c0_62, %c0_63] : memref<4x1x8xf32, #tpu.memory_space<vmem>>, vector<1x1x8xf32>
    %86 = vector.shape_cast %85 : vector<1x1x8xf32> to vector<1x8xf32>
    %87 = vector.broadcast %86 : vector<1x8xf32> to vector<16x8xf32>
    %88 = arith.addf %84, %87 : vector<16x8xf32>
    %cst_64 = arith.constant 0.353553385 : f32
    %89 = vector.broadcast %cst_64 : f32 to vector<16x8xf32>
    %90 = arith.mulf %88, %89 : vector<16x8xf32>
    %91 = vector.shape_cast %90 : vector<16x8xf32> to vector<2x8x8xf32>
    %c2_65 = arith.constant 2 : index
    %c0_66 = arith.constant 0 : index
    %c0_67 = arith.constant 0 : index
    %92 = vector.load %arg6[%c2_65, %c0_66, %c0_67] : memref<4x32x8xf32, #tpu.memory_space<vmem>>, vector<1x32x8xf32>
    %93 = vector.shape_cast %92 : vector<1x32x8xf32> to vector<32x8xf32>
    %cst_68 = arith.constant dense<0.000000e+00> : vector<16x8xf32>
    %94 = tpu.matmul %3, %93, %cst_68 {dimension_numbers = #tpu.dot_dimension_numbers<[1], [0], [0], [1], [0, 0, 1, 1], [], []>} : vector<16x32xf32>, vector<32x8xf32>, vector<16x8xf32> -> vector<16x8xf32>
    %c2_69 = arith.constant 2 : index
    %c0_70 = arith.constant 0 : index
    %c0_71 = arith.constant 0 : index
    %95 = vector.load %arg7[%c2_69, %c0_70, %c0_71] : memref<4x1x8xf32, #tpu.memory_space<vmem>>, vector<1x1x8xf32>
    %96 = vector.shape_cast %95 : vector<1x1x8xf32> to vector<1x8xf32>
    %97 = vector.broadcast %96 : vector<1x8xf32> to vector<16x8xf32>
    %98 = arith.addf %94, %97 : vector<16x8xf32>
    %99 = vector.shape_cast %98 : vector<16x8xf32> to vector<2x8x8xf32>
    %c2_72 = arith.constant 2 : index
    %c0_73 = arith.constant 0 : index
    %c0_74 = arith.constant 0 : index
    %100 = vector.load %arg8[%c2_72, %c0_73, %c0_74] : memref<4x32x8xf32, #tpu.memory_space<vmem>>, vector<1x32x8xf32>
    %101 = vector.shape_cast %100 : vector<1x32x8xf32> to vector<32x8xf32>
    %cst_75 = arith.constant dense<0.000000e+00> : vector<16x8xf32>
    %102 = tpu.matmul %5, %101, %cst_75 {dimension_numbers = #tpu.dot_dimension_numbers<[1], [0], [0], [1], [0, 0, 1, 1], [], []>} : vector<16x32xf32>, vector<32x8xf32>, vector<16x8xf32> -> vector<16x8xf32>
    %c2_76 = arith.constant 2 : index
    %c0_77 = arith.constant 0 : index
    %c0_78 = arith.constant 0 : index
    %103 = vector.load %arg9[%c2_76, %c0_77, %c0_78] : memref<4x1x8xf32, #tpu.memory_space<vmem>>, vector<1x1x8xf32>
    %104 = vector.shape_cast %103 : vector<1x1x8xf32> to vector<1x8xf32>
    %105 = vector.broadcast %104 : vector<1x8xf32> to vector<16x8xf32>
    %106 = arith.addf %102, %105 : vector<16x8xf32>
    %107 = vector.shape_cast %106 : vector<16x8xf32> to vector<2x8x8xf32>
    "tpu.trace_start"() <{level = 10 : i32, message = "bqd,bkd->bqk"}> : () -> ()
    %cst_79 = arith.constant dense<0.000000e+00> : vector<2x8x8xf32>
    %108 = tpu.matmul %91, %99, %cst_79 {dimension_numbers = #tpu.dot_dimension_numbers<[2], [2], [1], [1], [0, 0, 0, 1, 1, 1], [0], [0]>} : vector<2x8x8xf32>, vector<2x8x8xf32>, vector<2x8x8xf32> -> vector<2x8x8xf32>
    "tpu.trace_stop"() : () -> ()
    %cst_80 = arith.constant dense<0xFF800000> : vector<2x8xf32>
    %109 = vector.multi_reduction <maximumf>, %108, %cst_80 [2] : vector<2x8x8xf32> to vector<2x8xf32>
    %110 = vector.shape_cast %109 : vector<2x8xf32> to vector<2x8x1xf32>
    %111 = vector.broadcast %110 : vector<2x8x1xf32> to vector<2x8x8xf32>
    %112 = arith.subf %108, %111 : vector<2x8x8xf32>
    %113 = math.exp %112 : vector<2x8x8xf32>
    %cst_81 = arith.constant dense<0.000000e+00> : vector<2x8xf32>
    %114 = vector.multi_reduction <add>, %113, %cst_81 [2] : vector<2x8x8xf32> to vector<2x8xf32>
    %115 = vector.shape_cast %114 : vector<2x8xf32> to vector<2x8x1xf32>
    %116 = tpu.reciprocal %115 {approx = true} : vector<2x8x1xf32> -> vector<2x8x1xf32>
    %117 = vector.broadcast %116 : vector<2x8x1xf32> to vector<2x8x8xf32>
    %118 = arith.mulf %113, %117 : vector<2x8x8xf32>
    "tpu.trace_start"() <{level = 10 : i32, message = "bqk,bkd->bqd"}> : () -> ()
    %cst_82 = arith.constant dense<0.000000e+00> : vector<2x8x8xf32>
    %119 = tpu.matmul %118, %107, %cst_82 {dimension_numbers = #tpu.dot_dimension_numbers<[2], [1], [1], [2], [0, 0, 0, 1, 1, 2], [0], [0]>} : vector<2x8x8xf32>, vector<2x8x8xf32>, vector<2x8x8xf32> -> vector<2x8x8xf32>
    "tpu.trace_stop"() : () -> ()
    %c3 = arith.constant 3 : index
    %c0_83 = arith.constant 0 : index
    %c0_84 = arith.constant 0 : index
    %120 = vector.load %arg4[%c3, %c0_83, %c0_84] : memref<4x32x8xf32, #tpu.memory_space<vmem>>, vector<1x32x8xf32>
    %121 = vector.shape_cast %120 : vector<1x32x8xf32> to vector<32x8xf32>
    %cst_85 = arith.constant dense<0.000000e+00> : vector<16x8xf32>
    %122 = tpu.matmul %1, %121, %cst_85 {dimension_numbers = #tpu.dot_dimension_numbers<[1], [0], [0], [1], [0, 0, 1, 1], [], []>} : vector<16x32xf32>, vector<32x8xf32>, vector<16x8xf32> -> vector<16x8xf32>
    %c3_86 = arith.constant 3 : index
    %c0_87 = arith.constant 0 : index
    %c0_88 = arith.constant 0 : index
    %123 = vector.load %arg5[%c3_86, %c0_87, %c0_88] : memref<4x1x8xf32, #tpu.memory_space<vmem>>, vector<1x1x8xf32>
    %124 = vector.shape_cast %123 : vector<1x1x8xf32> to vector<1x8xf32>
    %125 = vector.broadcast %124 : vector<1x8xf32> to vector<16x8xf32>
    %126 = arith.addf %122, %125 : vector<16x8xf32>
    %cst_89 = arith.constant 0.353553385 : f32
    %127 = vector.broadcast %cst_89 : f32 to vector<16x8xf32>
    %128 = arith.mulf %126, %127 : vector<16x8xf32>
    %129 = vector.shape_cast %128 : vector<16x8xf32> to vector<2x8x8xf32>
    %c3_90 = arith.constant 3 : index
    %c0_91 = arith.constant 0 : index
    %c0_92 = arith.constant 0 : index
    %130 = vector.load %arg6[%c3_90, %c0_91, %c0_92] : memref<4x32x8xf32, #tpu.memory_space<vmem>>, vector<1x32x8xf32>
    %131 = vector.shape_cast %130 : vector<1x32x8xf32> to vector<32x8xf32>
    %cst_93 = arith.constant dense<0.000000e+00> : vector<16x8xf32>
    %132 = tpu.matmul %3, %131, %cst_93 {dimension_numbers = #tpu.dot_dimension_numbers<[1], [0], [0], [1], [0, 0, 1, 1], [], []>} : vector<16x32xf32>, vector<32x8xf32>, vector<16x8xf32> -> vector<16x8xf32>
    %c3_94 = arith.constant 3 : index
    %c0_95 = arith.constant 0 : index
    %c0_96 = arith.constant 0 : index
    %133 = vector.load %arg7[%c3_94, %c0_95, %c0_96] : memref<4x1x8xf32, #tpu.memory_space<vmem>>, vector<1x1x8xf32>
    %134 = vector.shape_cast %133 : vector<1x1x8xf32> to vector<1x8xf32>
    %135 = vector.broadcast %134 : vector<1x8xf32> to vector<16x8xf32>
    %136 = arith.addf %132, %135 : vector<16x8xf32>
    %137 = vector.shape_cast %136 : vector<16x8xf32> to vector<2x8x8xf32>
    %c3_97 = arith.constant 3 : index
    %c0_98 = arith.constant 0 : index
    %c0_99 = arith.constant 0 : index
    %138 = vector.load %arg8[%c3_97, %c0_98, %c0_99] : memref<4x32x8xf32, #tpu.memory_space<vmem>>, vector<1x32x8xf32>
    %139 = vector.shape_cast %138 : vector<1x32x8xf32> to vector<32x8xf32>
    %cst_100 = arith.constant dense<0.000000e+00> : vector<16x8xf32>
    %140 = tpu.matmul %5, %139, %cst_100 {dimension_numbers = #tpu.dot_dimension_numbers<[1], [0], [0], [1], [0, 0, 1, 1], [], []>} : vector<16x32xf32>, vector<32x8xf32>, vector<16x8xf32> -> vector<16x8xf32>
    %c3_101 = arith.constant 3 : index
    %c0_102 = arith.constant 0 : index
    %c0_103 = arith.constant 0 : index
    %141 = vector.load %arg9[%c3_101, %c0_102, %c0_103] : memref<4x1x8xf32, #tpu.memory_space<vmem>>, vector<1x1x8xf32>
    %142 = vector.shape_cast %141 : vector<1x1x8xf32> to vector<1x8xf32>
    %143 = vector.broadcast %142 : vector<1x8xf32> to vector<16x8xf32>
    %144 = arith.addf %140, %143 : vector<16x8xf32>
    %145 = vector.shape_cast %144 : vector<16x8xf32> to vector<2x8x8xf32>
    "tpu.trace_start"() <{level = 10 : i32, message = "bqd,bkd->bqk"}> : () -> ()
    %cst_104 = arith.constant dense<0.000000e+00> : vector<2x8x8xf32>
    %146 = tpu.matmul %129, %137, %cst_104 {dimension_numbers = #tpu.dot_dimension_numbers<[2], [2], [1], [1], [0, 0, 0, 1, 1, 1], [0], [0]>} : vector<2x8x8xf32>, vector<2x8x8xf32>, vector<2x8x8xf32> -> vector<2x8x8xf32>
    "tpu.trace_stop"() : () -> ()
    %cst_105 = arith.constant dense<0xFF800000> : vector<2x8xf32>
    %147 = vector.multi_reduction <maximumf>, %146, %cst_105 [2] : vector<2x8x8xf32> to vector<2x8xf32>
    %148 = vector.shape_cast %147 : vector<2x8xf32> to vector<2x8x1xf32>
    %149 = vector.broadcast %148 : vector<2x8x1xf32> to vector<2x8x8xf32>
    %150 = arith.subf %146, %149 : vector<2x8x8xf32>
    %151 = math.exp %150 : vector<2x8x8xf32>
    %cst_106 = arith.constant dense<0.000000e+00> : vector<2x8xf32>
    %152 = vector.multi_reduction <add>, %151, %cst_106 [2] : vector<2x8x8xf32> to vector<2x8xf32>
    %153 = vector.shape_cast %152 : vector<2x8xf32> to vector<2x8x1xf32>
    %154 = tpu.reciprocal %153 {approx = true} : vector<2x8x1xf32> -> vector<2x8x1xf32>
    %155 = vector.broadcast %154 : vector<2x8x1xf32> to vector<2x8x8xf32>
    %156 = arith.mulf %151, %155 : vector<2x8x8xf32>
    "tpu.trace_start"() <{level = 10 : i32, message = "bqk,bkd->bqd"}> : () -> ()
    %cst_107 = arith.constant dense<0.000000e+00> : vector<2x8x8xf32>
    %157 = tpu.matmul %156, %145, %cst_107 {dimension_numbers = #tpu.dot_dimension_numbers<[2], [1], [1], [2], [0, 0, 0, 1, 1, 2], [0], [0]>} : vector<2x8x8xf32>, vector<2x8x8xf32>, vector<2x8x8xf32> -> vector<2x8x8xf32>
    "tpu.trace_stop"() : () -> ()
    %158 = tpu.concatenate %43, %81, %119, %157 in 2 : vector<2x8x8xf32>, vector<2x8x8xf32>, vector<2x8x8xf32>, vector<2x8x8xf32> -> vector<2x8x32xf32>
    %c0_108 = arith.constant 0 : index
    %c0_109 = arith.constant 0 : index
    %c0_110 = arith.constant 0 : index
    %159 = vector.load %arg10[%c0_108, %c0_109, %c0_110] : memref<2x8x32xf32, #tpu.memory_space<vmem>>, vector<2x8x32xf32>
    tpu.vector_store %arg10[%c0_108, %c0_109, %c0_110], %158 {strides = array<i32>} : memref<2x8x32xf32, #tpu.memory_space<vmem>>, vector<2x8x32xf32>,
    return
  }
  func.func @transform_0(%arg0: i32) -> (i32, i32, i32) {
    %c0_i32 = arith.constant 0 : i32
    %c0_i32_0 = arith.constant 0 : i32
    %c0_i32_1 = arith.constant 0 : i32
    return %arg0, %c0_i32, %c0_i32_0 : i32, i32, i32
  }
  func.func @transform_1(%arg0: i32) -> (i32, i32, i32) {
    %c0_i32 = arith.constant 0 : i32
    %c0_i32_0 = arith.constant 0 : i32
    %c0_i32_1 = arith.constant 0 : i32
    return %arg0, %c0_i32, %c0_i32_0 : i32, i32, i32
  }
  func.func @transform_2(%arg0: i32) -> (i32, i32, i32) {
    %c0_i32 = arith.constant 0 : i32
    %c0_i32_0 = arith.constant 0 : i32
    %c0_i32_1 = arith.constant 0 : i32
    return %arg0, %c0_i32, %c0_i32_0 : i32, i32, i32
  }
  func.func @transform_3(%arg0: i32) -> (i32, i32, i32) {
    %c0_i32 = arith.constant 0 : i32
    %c0_i32_0 = arith.constant 0 : i32
    %c0_i32_1 = arith.constant 0 : i32
    %c0_i32_2 = arith.constant 0 : i32
    return %c0_i32, %c0_i32_0, %c0_i32_1 : i32, i32, i32
  }
  func.func @transform_4(%arg0: i32) -> (i32, i32, i32) {
    %c0_i32 = arith.constant 0 : i32
    %c0_i32_0 = arith.constant 0 : i32
    %c0_i32_1 = arith.constant 0 : i32
    %c0_i32_2 = arith.constant 0 : i32
    return %c0_i32, %c0_i32_0, %c0_i32_1 : i32, i32, i32
  }
  func.func @transform_5(%arg0: i32) -> (i32, i32, i32) {
    %c0_i32 = arith.constant 0 : i32
    %c0_i32_0 = arith.constant 0 : i32
    %c0_i32_1 = arith.constant 0 : i32
    %c0_i32_2 = arith.constant 0 : i32
    return %c0_i32, %c0_i32_0, %c0_i32_1 : i32, i32, i32
  }
  func.func @transform_6(%arg0: i32) -> (i32, i32, i32) {
    %c0_i32 = arith.constant 0 : i32
    %c0_i32_0 = arith.constant 0 : i32
    %c0_i32_1 = arith.constant 0 : i32
    %c0_i32_2 = arith.constant 0 : i32
    return %c0_i32, %c0_i32_0, %c0_i32_1 : i32, i32, i32
  }
  func.func @transform_7(%arg0: i32) -> (i32, i32, i32) {
    %c0_i32 = arith.constant 0 : i32
    %c0_i32_0 = arith.constant 0 : i32
    %c0_i32_1 = arith.constant 0 : i32
    %c0_i32_2 = arith.constant 0 : i32
    return %c0_i32, %c0_i32_0, %c0_i32_1 : i32, i32, i32
  }
  func.func @transform_8(%arg0: i32) -> (i32, i32, i32) {
    %c0_i32 = arith.constant 0 : i32
    %c0_i32_0 = arith.constant 0 : i32
    %c0_i32_1 = arith.constant 0 : i32
    %c0_i32_2 = arith.constant 0 : i32
    return %c0_i32, %c0_i32_0, %c0_i32_1 : i32, i32, i32
  }
  func.func @transform_9(%arg0: i32) -> (i32, i32, i32) {
    %c0_i32 = arith.constant 0 : i32
    %c0_i32_0 = arith.constant 0 : i32
    %c0_i32_1 = arith.constant 0 : i32
    return %arg0, %c0_i32, %c0_i32_0 : i32, i32, i32
  }
}

</mosaic_0001>

<bundles_post_ra>
// kernel: tpu_custom_call.1
= control target key start
LH: loop header
LB: loop body
LE: loop exit
PB: predicated region body
PF: predicated region fallthrough
CT: control target
= control target key end

     0   :  { %vm50_vm0 = vcmask 261120   ;;  %s3467_s0 = inlined_call_operand.vmem [shape: f32[2,8,32], index: 0, kind: input, shape index: {}]   ;;  %s3468_s1 = inlined_call_operand.vmem [shape: f32[2,8,32], index: 1, kind: input, shape index: {}]   ;;  %s3469_s2 = inlined_call_operand.vmem [shape: f32[2,8,32], index: 2, kind: input, shape index: {}]   ;;  %s3470_s3 = inlined_call_operand.vmem [shape: f32[4,32,8], index: 3, kind: input, shape index: {}]   ;;  %s3471_s4 = inlined_call_operand.vmem [shape: f32[4,1,8], index: 4, kind: input, shape index: {}]   ;;  %s3472_s5 = inlined_call_operand.vmem [shape: f32[4,32,8], index: 5, kind: input, shape index: {}]   ;;  %s3473_s6 = inlined_call_operand.vmem [shape: f32[4,1,8], index: 6, kind: input, shape index: {}]   ;;  %s3474_s7 = inlined_call_operand.vmem [shape: f32[4,32,8], index: 7, kind: input, shape index: {}]   ;;  %s3475_s8 = inlined_call_operand.vmem [shape: f32[4,1,8], index: 8, kind: input, shape index: {}]   ;;  %s3476_s9 = inlined_call_operand.hbm [shape: f32[2,8,32], index: 9, kind: output, shape index: {}]  }
   0x1   :  { %v39_v0 = vld [vmem:[%s3470_s3] sm:$0xff]  ;;  %v40_v1 = vld [vmem:[%s3470_s3 + $0x8] sm:$0xff]  ;;  %v41_v5 = vld [vmem:[%s3470_s3 + $0x10] sm:$0xff] }
   0x2   :  { %v134_v2 = vld [vmem:[%s3472_s5] sm:$0xff]  ;;  %v2868_v3 = vpack.c.bf16 %v40_v1, %v39_v0  ;;  %v135_v4 = vld [vmem:[%s3472_s5 + $0x8] sm:$0xff]  ;;  %v42_v6 = vld [vmem:[%s3470_s3 + $0x18] sm:$0xff] }
   0x3   :  { %v2876_v7 = vpack.c.bf16 %v135_v4, %v134_v2  ;;  %v2872_v8 = vpack.c.bf16 %v42_v6, %v41_v5  ;;  %v136_v9 = vld [vmem:[%s3472_s5 + $0x10] sm:$0xff]  ;;  %v137_v10 = vld [vmem:[%s3472_s5 + $0x18] sm:$0xff]  ;;  %v3111_v11 = vld [vmem:[%s3469_s2] sm:$0xff] }
   0x4   :  { %2869 = vmatprep.subr.bf16.mxu0 %v2868_v3  ;;  %v2880_v12 = vpack.c.bf16 %v137_v10, %v136_v9  ;;  %2664 = vmatprep.mubr.msk.f32.mxu0 %vm50_vm0, %v3111_v11  ;;  %v3118_v13 = vld [vmem:[%s3467_s0] sm:$0xff] }
   0x5   :  { %2877 = vmatprep.subr.bf16.mxu1 %v2876_v7  ;;  %2871 = vmatpush3.bf16.msra.mxu0 %v2868_v3 }
   0x6   :  { %14 = vsyncpa [#allocation3], 0  ;;  %2879 = vmatpush3.bf16.msra.mxu1 %v2876_v7  ;;  %2873 = vmatprep.subr.bf16.mxu0 %v2872_v8  ;;  %v3125_v14 = vld [vmem:[%s3469_s2 + $0x8] sm:$0xff]  ;;  %v3027_v16 = vmov 0.0   ;;  %vm3028_vm1 = vmmov 0   ;;  %vm318_vm2 = vcmask 64512  }
   0x7   :  { %2881 = vmatprep.subr.bf16.mxu1 %v2880_v12  ;;  %2675 = vmatprep.mubr.msk.f32.mxu1 %vm50_vm0, %v3118_v13  ;;  %v3130_v15 = vld [vmem:[%s3467_s0 + $0x8] sm:$0xff]  ;;  %v2447_v17 = vld [vmem:[%s3471_s4] ss:$0 sm:$0xff]  ;;  %v228_v31 = vld [vmem:[%s3474_s7 + $0x10] sm:$0xff]  ;;  %s3030_s18 = smov 16   ;;  %vm2423_vm3 = vcmask 130048  }
   0x8   :  { %v2450_v19 = vld [vmem:[%s3473_s6] ss:$0 sm:$0xff]  ;;  %v227_v30 = vld [vmem:[%s3474_s7 + $0x8] sm:$0xff]  ;;  %v229_v33 = vld [vmem:[%s3474_s7 + $0x18] sm:$0xff]  ;;  %vm2426_vm4 = vcmask 195584   ;;  %s3032_s19 = smov [#allocation2]  }
   0x9   :  { %2875 = vmatpush3.bf16.msra.mxu0 %v2872_v8  ;;  %v226_v29 = vld [vmem:[%s3474_s7] sm:$0xff]  ;;  %v2888_v35 = vpack.c.bf16 %v229_v33, %v228_v31  ;;  %v3177_v36 = vld [vmem:[%s3468_s1 + $0x8] sm:$0xff]  ;;  %v2472_v2 = vld [vmem:[%s3472_s5 + $0x30] sm:$0xff]  ;;  %s2436_s20 = sshll.u32 %s3032_s19, 4  ;;  %s2437_s20 = int_to_ptr.vmem [resolvable:$true] %s2436_s20 }
   0xa   :  { %2883 = vmatpush3.bf16.msra.mxu1 %v2880_v12  ;;  %v2884_v32 = vpack.c.bf16 %v227_v30, %v226_v29  ;;  %v3170_v34 = vld [vmem:[%s3468_s1] sm:$0xff]  ;;  %v2471_v58 = vld [vmem:[%s3472_s5 + $0x28] sm:$0xff]  ;;  %v2473_v3 = vld [vmem:[%s3472_s5 + $0x38] sm:$0xff]  ;;  %s3003_s21 = scalar_lea.vmem %s2437_s20, 256  ;;  %p3008_p1 = scmp.lt.s32.totalorder %s2437_s20, %s2437_s20 }
   0xb   :  { %2689 = vmatprep.subr.mxu1 %v3027_v16  ;;  %v2453_v54 = vld [vmem:[%s3475_s8] ss:$0 sm:$0xff]  ;;  %v2463_v62 = vld [vmem:[%s3470_s3 + $0x28] sm:$0xff]  ;;  %v2904_v6 = vpack.c.bf16 %v2473_v3, %v2472_v2  ;;  %v2464_v7 = vld [vmem:[%s3470_s3 + $0x30] sm:$0xff]  ;;  %p3004_p0 = scmp.ne.s32.totalorder %s2437_s20, %s3003_s21  ;;  %p3009_p2 = scmp.lt.s32.totalorder %s3003_s21, %s3003_s21 }
   0xc   :  { %2665 = vmatmul.mubr.msk.f32.vlgmr.msra.gmra.mrb[0].mxu0 %vm50_vm0, %v3125_v14  ;;  %2885 = vmatprep.subr.bf16.mxu0 %v2884_v32  ;;  %v2470_v57 = vld [vmem:[%s3472_s5 + $0x20] sm:$0xff]  ;;  %v2465_v8 = vld [vmem:[%s3470_s3 + $0x38] sm:$0xff]  ;;  %v2501_v2 = vld [vmem:[%s3472_s5 + $0x48] sm:$0xff] }
   0xd   :  { %2676 = vmatmul.mubr.msk.f32.vlgmr.msra.gmra.mrb[0].mxu1 %vm50_vm0, %v3130_v15  ;;  %2686 = vmatprep.mubr.msk.f32.mxu0 %vm50_vm0, %v3170_v34  ;;  %v2900_v60 = vpack.c.bf16 %v2471_v58, %v2470_v57  ;;  %v2462_v61 = vld [vmem:[%s3470_s3 + $0x20] sm:$0xff]  ;;  %v2896_v12 = vpack.c.bf16 %v2465_v8, %v2464_v7  ;;  %v2495_v7 = vld [vmem:[%s3470_s3 + $0x58] sm:$0xff]  ;;  %p3010_p3 = por %p3009_p2, %p3008_p1 }
   0xe   :  { %2691 = vmatprep.mubr.msk.f32.mxu1 %vm3028_vm1, %v3027_v16  ;;  %2887 = vmatpush3.bf16.msra.mxu0 %v2884_v32  ;;  %v2892_v63 = vpack.c.bf16 %v2463_v62, %v2462_v61  ;;  %v2478_v33 = vld [vmem:[%s3474_s7 + $0x20] sm:$0xff] }
   0xf   :  { %2889 = vmatprep.subr.bf16.mxu0 %v2888_v35  ;;  %v2483_v58 = vld [vmem:[%s3475_s8 + $0x1] ss:$0 sm:$0xff]  ;;  %p3011_p4 = pnand %p3010_p3, %p3004_p0 }
  0x10   :  { %v2492_v62 = vld [vmem:[%s3470_s3 + $0x40] sm:$0xff] }
  0x12   :  { %2891 = vmatpush3.bf16.msra.mxu0 %v2888_v35  ;;  %v2479_v35 = vld [vmem:[%s3474_s7 + $0x28] sm:$0xff] }
  0x13   :  { %2699 = vmatprep.subr.mxu0 %v3027_v16 }
  0x15   :  { %2687 = vmatmul.mubr.msk.f32.vlgmr.msra.gmra.mrb[2].mxu0 %vm50_vm0, %v3177_v36 }
  0x16   :  { %2701 = vmatprep.mubr.msk.f32.mxu0 %vm3028_vm1, %v3027_v16 }
  0xdf   :  { %v2666_v18 = vpop.f32.mrb[0].mxu0 }
  0xe0   :  { %v2677_v20 = vpop.f32.mrb[0].mxu1  ;;  %v123_v21 = vpop.f32.mrb[1].mxu0  ;;  %v129_v26 = vadd.f32 %v2666_v18, %v2447_v17 }
  0xe1   :  { %v124_v22 = vadd.f32 %v2447_v17, %v123_v21  ;;  %v217_v23 = vpop.f32.mrb[1].mxu1  ;;  %v223_v27 = vadd.f32 %v2677_v20, %v2450_v19  ;;  %v2475_v21 = vld [vmem:[%s3473_s6 + $0x1] ss:$0 sm:$0xff] }
  0xe2   :  { %v218_v24 = vadd.f32 %v2450_v19, %v217_v23  ;;  %v133_v28 = vmul.f32 0.35355338, %v129_v26 }
  0xe3   :  { %v132_v25 = vmul.f32 0.35355338, %v124_v22 }
  0xe4   :  { %2690 = vmatpush3.xpose.msk.msra.mxu1 %vm318_vm2, %v218_v24 }
  0xe5   :  { %2694 = vmatprep.subr.mxu1 %v3027_v16 }
  0xe7   :  { %2692 = vmatmul.mubr.msk.f32.vlgmr.msra.gmra.mrb[2].mxu1 %vm318_vm2, %v132_v25  ;;  %v2467_v25 = vld [vmem:[%s3471_s4 + $0x1] ss:$0 sm:$0xff] }
  0xe8   :  { %2695 = vmatpush3.xpose.msk.msra.mxu1 %vm318_vm2, %v223_v27  ;;  %2696 = vmatprep.mubr.msk.f32.mxu1 %vm3028_vm1, %v3027_v16  ;;  %v2688_v53 = vpop.f32.mrb[2].mxu0 }
  0xe9   :  { %2704 = vmatprep.subr.mxu1 %v3027_v16  ;;  %v315_v55 = vadd.f32 %v2688_v53, %v2453_v54  ;;  %v309_v56 = vpop.f32.mrb[3].mxu0 }
  0xea   :  { %v310_v59 = vadd.f32 %v2453_v54, %v309_v56 }
  0xeb   :  { %2697 = vmatmul.mubr.msk.f32.vlgmr.msra.gmra.mrb[4].mxu1 %vm318_vm2, %v133_v28 }
  0xec   :  { %2706 = vmatprep.mubr.msk.f32.mxu1 %vm3028_vm1, %v3027_v16  ;;  %2705 = vmatpush3.msra.mxu1 %v315_v55 }
  0xed   :  { %2700 = vmatpush3.msra.mxu0 %v310_v59  ;;  %2901 = vmatprep.subr.bf16.mxu1 %v2900_v60 }
  0xee   :  { %2893 = vmatprep.subr.bf16.mxu0 %v2892_v63 }
 0x1ba   :  { %v391_v37 = vpop.f32.mrb[2].mxu1 }
 0x1bb   :  { %v2693_v38 = vpop.f32.mrb[3].mxu1  ;;  %v471_v42 = vsel %vm318_vm2, %v391_v37, -inf }
 0x1bc   :  { %v2908_v38 = vpack.c.bf16 %v2479_v35, %v2478_v33 }
 0x1be   :  { %v467_v39 = vpop.f32.mrb[4].mxu1 }
 0x1bf   :  { %v2698_v40 = vpop.f32.mrb[5].mxu1  ;;  %v474_v41 = vsel %vm318_vm2, %v467_v39, -inf }
 0x1c0   :  { %475 = vmax.xlane.f32.xlu0 %v474_v41 }
 0x1c4   :  { %472 = vmax.xlane.f32.xlu0 %v471_v42 }
 0x24d   :  { %v476_v43 = vpop.xlane.xlu0 %475 }
 0x24e   :  { %v478_v44 = vsub.f32 %v467_v39, %v476_v43  ;;  %v2481_v39 = vld [vmem:[%s3474_s7 + $0x38] sm:$0xff] }
 0x250   :  { %v481_v45 = vmul.f32 1.442695, %v478_v44 }
 0x251   :  { %v473_v46 = vpop.xlane.xlu0 %472 }
 0x252   :  { %2971 = vpow2.f32 %v481_v45  ;;  %v477_v47 = vsub.f32 %v391_v37, %v473_v46  ;;  %v2480_v37 = vld [vmem:[%s3474_s7 + $0x30] sm:$0xff] }
 0x253   :  { %v2912_v40 = vpack.c.bf16 %v2481_v39, %v2480_v37 }
 0x254   :  { %v479_v48 = vmul.f32 1.442695, %v477_v47 }
 0x256   :  { %2973 = vpow2.f32 %v479_v48 }
 0x25c   :  { %v2972_v49 = vpop.eup %2971 }
 0x25d   :  { %v486_v50 = vsel %vm318_vm2, %v2972_v49, 0.0 }
 0x25e   :  { %487 = vadd.xlane.f32.xlu1 %v486_v50 }
 0x260   :  { %v2974_v51 = vpop.eup %2973 }
 0x261   :  { %v483_v52 = vsel %vm318_vm2, %v2974_v51, 0.0 }
 0x262   :  { %484 = vadd.xlane.f32.xlu1 %v483_v52 }
 0x2eb   :  { %v488_v0 = vpop.xlane.xlu1 %487 }
 0x2ec   :  { %2975 = vrcp.f32 %v488_v0  ;;  %v2500_v0 = vld [vmem:[%s3472_s5 + $0x40] sm:$0xff] }
 0x2ed   :  { %v2924_v3 = vpack.c.bf16 %v2501_v2, %v2500_v0  ;;  %v2513_v0 = vld [vmem:[%s3475_s8 + $0x2] ss:$0 sm:$0xff] }
 0x2ef   :  { %v485_v1 = vpop.xlane.xlu1 %484 }
 0x2f0   :  { %2977 = vrcp.f32 %v485_v1 }
 0x2f6   :  { %v2976_v4 = vpop.eup %2975 }
 0x2f7   :  { %v492_v5 = vmul.f32 %v2976_v4, %v2972_v49 }
 0x2f9   :  { %2707 = vmatmul.mubr.msk.f32.vlgmr.msra.gmra.mrb[6].mxu1 %vm318_vm2, %v492_v5 }
 0x2fa   :  { %v2978_v9 = vpop.eup %2977  ;;  %2903 = vmatpush3.bf16.msra.mxu1 %v2900_v60  ;;  %2728 = vmatprep.mubr.msk.f32.mxu1 %vm50_vm0, %v3118_v13 }
 0x2fb   :  { %v491_v10 = vmul.f32 %v2978_v9, %v2974_v51  ;;  %2905 = vmatprep.subr.bf16.mxu1 %v2904_v6 }
 0x2fd   :  { %2702 = vmatmul.mubr.msk.f32.vlgmr.msra.gmra.mrb[4].mxu0 %vm318_vm2, %v491_v10 }
 0x2fe   :  { %2895 = vmatpush3.bf16.msra.mxu0 %v2892_v63  ;;  %2907 = vmatpush3.bf16.msra.mxu1 %v2904_v6  ;;  %v2493_v63 = vld [vmem:[%s3470_s3 + $0x48] sm:$0xff]  ;;  %v2494_v6 = vld [vmem:[%s3470_s3 + $0x50] sm:$0xff] }
 0x2ff   :  { %2897 = vmatprep.subr.bf16.mxu0 %v2896_v12  ;;  %2717 = vmatprep.mubr.msk.f32.mxu0 %vm50_vm0, %v3111_v11  ;;  %v2916_v1 = vpack.c.bf16 %v2493_v63, %v2492_v62  ;;  %v2920_v10 = vpack.c.bf16 %v2495_v7, %v2494_v6  ;;  %v2522_v6 = vld [vmem:[%s3470_s3 + $0x60] sm:$0xff] }
 0x300   :  { %2742 = vmatprep.subr.mxu1 %v3027_v16 }
 0x301   :  { %2729 = vmatmul.mubr.msk.f32.vlgmr.msra.gmra.mrb[8].mxu1 %vm50_vm0, %v3130_v15 }
 0x302   :  { %2899 = vmatpush3.bf16.msra.mxu0 %v2896_v12  ;;  %2744 = vmatprep.mubr.msk.f32.mxu1 %vm3028_vm1, %v3027_v16  ;;  %v2502_v12 = vld [vmem:[%s3472_s5 + $0x50] sm:$0xff] }
 0x303   :  { %2909 = vmatprep.subr.bf16.mxu0 %v2908_v38 }
 0x305   :  { %2718 = vmatmul.mubr.msk.f32.vlgmr.msra.gmra.mrb[6].mxu0 %vm50_vm0, %v3125_v14 }
 0x306   :  { %2739 = vmatprep.mubr.msk.f32.mxu0 %vm50_vm0, %v3170_v34  ;;  %2911 = vmatpush3.bf16.msra.mxu0 %v2908_v38 }
 0x307   :  { %2913 = vmatprep.subr.bf16.mxu0 %v2912_v40 }
 0x30a   :  { %2915 = vmatpush3.bf16.msra.mxu0 %v2912_v40 }
 0x30b   :  { %2752 = vmatprep.subr.mxu0 %v3027_v16 }
 0x30d   :  { %2740 = vmatmul.mubr.msk.f32.vlgmr.msra.gmra.mrb[8].mxu0 %vm50_vm0, %v3177_v36 }
 0x30e   :  { %2754 = vmatprep.mubr.msk.f32.mxu0 %vm3028_vm1, %v3027_v16 }
 0x3cc   :  { %v3230_v17 = vpop.f32.mrb[6].mxu1 }
 0x3cd   :  { %v2708_v18 = vpop.f32.mrb[7].mxu1 }
 0x3ce   :  { %v2503_v18 = vld [vmem:[%s3472_s5 + $0x58] sm:$0xff] }
 0x3d0   :  { %v3232_v19 = vpop.f32.mrb[4].mxu0 }
 0x3d1   :  { %v2703_v20 = vpop.f32.mrb[5].mxu0 }
 0x3d4   :  { %v2730_v22 = vpop.f32.mrb[8].mxu1 }
 0x3d5   :  { %v808_v23 = vpop.f32.mrb[9].mxu1  ;;  %v814_v31 = vadd.f32 %v2730_v22, %v2475_v21  ;;  %v2928_v22 = vpack.c.bf16 %v2503_v18, %v2502_v12  ;;  %v2524_v18 = vld [vmem:[%s3470_s3 + $0x70] sm:$0xff] }
 0x3d6   :  { %v809_v24 = vadd.f32 %v2475_v21, %v808_v23 }
 0x3d8   :  { %v2719_v26 = vpop.f32.mrb[6].mxu0  ;;  %2743 = vmatpush3.xpose.msk.msra.mxu1 %vm318_vm2, %v809_v24 }
 0x3d9   :  { %v718_v27 = vpop.f32.mrb[7].mxu0  ;;  %2747 = vmatprep.subr.mxu1 %v3027_v16  ;;  %v724_v29 = vadd.f32 %v2719_v26, %v2467_v25 }
 0x3da   :  { %v719_v28 = vadd.f32 %v2467_v25, %v718_v27 }
 0x3db   :  { %v728_v32 = vmul.f32 0.35355338, %v724_v29 }
 0x3dc   :  { %v727_v30 = vmul.f32 0.35355338, %v719_v28  ;;  %v2497_v28 = vld [vmem:[%s3471_s4 + $0x2] ss:$0 sm:$0xff] }
 0x3de   :  { %2745 = vmatmul.mubr.msk.f32.vlgmr.msra.gmra.mrb[10].mxu1 %vm318_vm2, %v727_v30  ;;  %v2505_v30 = vld [vmem:[%s3473_s6 + $0x2] ss:$0 sm:$0xff] }
 0x3df   :  { %2748 = vmatpush3.xpose.msk.msra.mxu1 %vm318_vm2, %v814_v31  ;;  %2749 = vmatprep.mubr.msk.f32.mxu1 %vm3028_vm1, %v3027_v16 }
 0x3e0   :  { %2757 = vmatprep.subr.mxu1 %v3027_v16  ;;  %v2741_v57 = vpop.f32.mrb[8].mxu0 }
 0x3e1   :  { %v896_v59 = vpop.f32.mrb[9].mxu0  ;;  %v902_v61 = vadd.f32 %v2741_v57, %v2483_v58 }
 0x3e2   :  { %2750 = vmatmul.mubr.msk.f32.vlgmr.msra.gmra.mrb[12].mxu1 %vm318_vm2, %v728_v32  ;;  %v897_v60 = vadd.f32 %v2483_v58, %v896_v59 }
 0x3e3   :  { %2759 = vmatprep.mubr.msk.f32.mxu1 %vm3028_vm1, %v3027_v16  ;;  %2758 = vmatpush3.msra.mxu1 %v902_v61 }
 0x3e4   :  { %2753 = vmatpush3.msra.mxu0 %v897_v60  ;;  %2925 = vmatprep.subr.bf16.mxu1 %v2924_v3 }
 0x3e5   :  { %2917 = vmatprep.subr.bf16.mxu0 %v2916_v1 }
 0x4b1   :  { %v977_v41 = vpop.f32.mrb[10].mxu1 }
 0x4b2   :  { %v2746_v42 = vpop.f32.mrb[11].mxu1  ;;  %v1057_v43 = vsel %vm318_vm2, %v977_v41, -inf }
 0x4b3   :  { %1058 = vmax.xlane.f32.xlu1 %v1057_v43  ;;  %v2509_v42 = vld [vmem:[%s3474_s7 + $0x48] sm:$0xff]  ;;  %v2510_v43 = vld [vmem:[%s3474_s7 + $0x50] sm:$0xff] }
 0x4b5   :  { %v1053_v44 = vpop.f32.mrb[12].mxu1 }
 0x4b6   :  { %v2751_v45 = vpop.f32.mrb[13].mxu1  ;;  %v1060_v46 = vsel %vm318_vm2, %v1053_v44, -inf }
 0x4b7   :  { %1061 = vmax.xlane.f32.xlu0 %v1060_v46  ;;  %v2511_v45 = vld [vmem:[%s3474_s7 + $0x58] sm:$0xff] }
 0x4b8   :  { %v2936_v46 = vpack.c.bf16 %v2511_v45, %v2510_v43  ;;  %v2539_v45 = vld [vmem:[%s3474_s7 + $0x68] sm:$0xff] }
 0x540   :  { %v1059_v47 = vpop.xlane.xlu1 %1058 }
 0x541   :  { %v1063_v48 = vsub.f32 %v977_v41, %v1059_v47  ;;  %v2508_v41 = vld [vmem:[%s3474_s7 + $0x40] sm:$0xff] }
 0x543   :  { %v1065_v49 = vmul.f32 1.442695, %v1063_v48 }
 0x544   :  { %v1062_v50 = vpop.xlane.xlu0 %1061 }
 0x545   :  { %2979 = vpow2.f32 %v1065_v49  ;;  %v1064_v51 = vsub.f32 %v1053_v44, %v1062_v50  ;;  %v2932_v44 = vpack.c.bf16 %v2509_v42, %v2508_v41 }
 0x547   :  { %v1067_v52 = vmul.f32 1.442695, %v1064_v51 }
 0x549   :  { %2981 = vpow2.f32 %v1067_v52 }
 0x54f   :  { %v2980_v53 = vpop.eup %2979 }
 0x550   :  { %v1069_v54 = vsel %vm318_vm2, %v2980_v53, 0.0 }
 0x551   :  { %1070 = vadd.xlane.f32.xlu1 %v1069_v54 }
 0x553   :  { %v2982_v55 = vpop.eup %2981 }
 0x554   :  { %v1072_v56 = vsel %vm318_vm2, %v2982_v55, 0.0 }
 0x555   :  { %1073 = vadd.xlane.f32.xlu0 %v1072_v56 }
 0x5de   :  { %v1071_v4 = vpop.xlane.xlu1 %1070 }
 0x5df   :  { %2983 = vrcp.f32 %v1071_v4  ;;  %v2530_v4 = vld [vmem:[%s3472_s5 + $0x60] sm:$0xff] }
 0x5e2   :  { %v1074_v5 = vpop.xlane.xlu0 %1073 }
 0x5e3   :  { %2985 = vrcp.f32 %v1074_v5  ;;  %v2531_v5 = vld [vmem:[%s3472_s5 + $0x68] sm:$0xff] }
 0x5e4   :  { %v2948_v7 = vpack.c.bf16 %v2531_v5, %v2530_v4 }
 0x5e9   :  { %v2984_v8 = vpop.eup %2983 }
 0x5ea   :  { %v1077_v9 = vmul.f32 %v2984_v8, %v2980_v53  ;;  %v2523_v8 = vld [vmem:[%s3470_s3 + $0x68] sm:$0xff] }
 0x5ec   :  { %2755 = vmatmul.mubr.msk.f32.vlgmr.msra.gmra.mrb[10].mxu0 %vm318_vm2, %v1077_v9  ;;  %v2940_v9 = vpack.c.bf16 %v2523_v8, %v2522_v6 }
 0x5ed   :  { %v2986_v20 = vpop.eup %2985  ;;  %2919 = vmatpush3.bf16.msra.mxu0 %v2916_v1  ;;  %2770 = vmatprep.mubr.msk.f32.mxu0 %vm50_vm0, %v3111_v11 }
 0x5ee   :  { %v1078_v21 = vmul.f32 %v2986_v20, %v2982_v55  ;;  %2921 = vmatprep.subr.bf16.mxu0 %v2920_v10  ;;  %v2525_v20 = vld [vmem:[%s3470_s3 + $0x78] sm:$0xff] }
 0x5f0   :  { %2760 = vmatmul.mubr.msk.f32.vlgmr.msra.gmra.mrb[14].mxu1 %vm318_vm2, %v1078_v21 }
 0x5f1   :  { %2927 = vmatpush3.bf16.msra.mxu1 %v2924_v3  ;;  %2923 = vmatpush3.bf16.msra.mxu0 %v2920_v10 }
 0x5f2   :  { %2929 = vmatprep.subr.bf16.mxu1 %v2928_v22  ;;  %2781 = vmatprep.mubr.msk.f32.mxu1 %vm50_vm0, %v3118_v13 }
 0x5f3   :  { %2933 = vmatprep.subr.bf16.mxu0 %v2932_v44 }
 0x5f4   :  { %2771 = vmatmul.mubr.msk.f32.vlgmr.msra.gmra.mrb[12].mxu0 %vm50_vm0, %v3125_v14 }
 0x5f5   :  { %2931 = vmatpush3.bf16.msra.mxu1 %v2928_v22  ;;  %2792 = vmatprep.mubr.msk.f32.mxu0 %vm50_vm0, %v3170_v34 }
 0x5f6   :  { %2795 = vmatprep.subr.mxu1 %v3027_v16  ;;  %2935 = vmatpush3.bf16.msra.mxu0 %v2932_v44  ;;  %v2538_v44 = vld [vmem:[%s3474_s7 + $0x60] sm:$0xff] }
 0x5f7   :  { %2937 = vmatprep.subr.bf16.mxu0 %v2936_v46 }
 0x5f8   :  { %2782 = vmatmul.mubr.msk.f32.vlgmr.msra.gmra.mrb[16].mxu1 %vm50_vm0, %v3130_v15 }
 0x5f9   :  { %2797 = vmatprep.mubr.msk.f32.mxu1 %vm3028_vm1, %v3027_v16 }
 0x5fa   :  { %2939 = vmatpush3.bf16.msra.mxu0 %v2936_v46  ;;  %v2540_v46 = vld [vmem:[%s3474_s7 + $0x70] sm:$0xff] }
 0x5fb   :  { %2805 = vmatprep.subr.mxu0 %v3027_v16 }
 0x5fd   :  { %2793 = vmatmul.mubr.msk.f32.vlgmr.msra.gmra.mrb[14].mxu0 %vm50_vm0, %v3177_v36 }
 0x5fe   :  { %2807 = vmatprep.mubr.msk.f32.mxu0 %vm3028_vm1, %v3027_v16 }
 0x6bf   :  { %v3313_v23 = vpop.f32.mrb[10].mxu0 }
 0x6c0   :  { %v2756_v24 = vpop.f32.mrb[11].mxu0 }
 0x6c1   :  { %v2944_v24 = vpack.c.bf16 %v2525_v20, %v2524_v18 }
 0x6c3   :  { %v3315_v25 = vpop.f32.mrb[14].mxu1 }
 0x6c4   :  { %v2761_v26 = vpop.f32.mrb[15].mxu1 }
 0x6c5   :  { %v2532_v26 = vld [vmem:[%s3472_s5 + $0x70] sm:$0xff] }
 0x6c7   :  { %v2772_v27 = vpop.f32.mrb[12].mxu0 }
 0x6c8   :  { %v1304_v29 = vpop.f32.mrb[13].mxu0  ;;  %v1310_v38 = vadd.f32 %v2772_v27, %v2497_v28  ;;  %v2533_v27 = vld [vmem:[%s3472_s5 + $0x78] sm:$0xff] }
 0x6c9   :  { %v1305_v31 = vadd.f32 %v2497_v28, %v1304_v29 }
 0x6ca   :  { %v1314_v40 = vmul.f32 0.35355338, %v1310_v38 }
 0x6cb   :  { %v2783_v32 = vpop.f32.mrb[16].mxu1  ;;  %v1313_v37 = vmul.f32 0.35355338, %v1305_v31 }
 0x6cc   :  { %v1394_v33 = vpop.f32.mrb[17].mxu1  ;;  %v1400_v39 = vadd.f32 %v2783_v32, %v2505_v30 }
 0x6cd   :  { %v1395_v35 = vadd.f32 %v2505_v30, %v1394_v33  ;;  %v2952_v30 = vpack.c.bf16 %v2533_v27, %v2532_v26 }
 0x6cf   :  { %2796 = vmatpush3.xpose.msk.msra.mxu1 %vm318_vm2, %v1395_v35  ;;  %v2535_v35 = vld [vmem:[%s3473_s6 + $0x3] ss:$0 sm:$0xff] }
 0x6d0   :  { %2800 = vmatprep.subr.mxu1 %v3027_v16  ;;  %v2794_v63 = vpop.f32.mrb[14].mxu0 }
 0x6d1   :  { %v1482_v1 = vpop.f32.mrb[15].mxu0  ;;  %v1488_v3 = vadd.f32 %v2794_v63, %v2513_v0 }
 0x6d2   :  { %2798 = vmatmul.mubr.msk.f32.vlgmr.msra.gmra.mrb[18].mxu1 %vm318_vm2, %v1313_v37  ;;  %v1483_v2 = vadd.f32 %v2513_v0, %v1482_v1  ;;  %v2543_v1 = vld [vmem:[%s3475_s8 + $0x3] ss:$0 sm:$0xff]  ;;  %s3031_s8 = smov 24  }
 0x6d3   :  { %2801 = vmatpush3.xpose.msk.msra.mxu1 %vm318_vm2, %v1400_v39  ;;  %2802 = vmatprep.mubr.msk.f32.mxu1 %vm3028_vm1, %v3027_v16 }
 0x6d4   :  { %2810 = vmatprep.subr.mxu1 %v3027_v16  ;;  %2806 = vmatpush3.msra.mxu0 %v1483_v2 }
 0x6d5   :  { %2941 = vmatprep.subr.bf16.mxu0 %v2940_v9 }
 0x6d6   :  { %2803 = vmatmul.mubr.msk.f32.vlgmr.msra.gmra.mrb[20].mxu1 %vm318_vm2, %v1314_v40 }
 0x6d7   :  { %2812 = vmatprep.mubr.msk.f32.mxu1 %vm3028_vm1, %v3027_v16  ;;  %2811 = vmatpush3.msra.mxu1 %v1488_v3 }
 0x6d8   :  { %2949 = vmatprep.subr.bf16.mxu1 %v2948_v7 }
 0x7a5   :  { %v1563_v47 = vpop.f32.mrb[18].mxu1 }
 0x7a6   :  { %v2799_v48 = vpop.f32.mrb[19].mxu1  ;;  %v1643_v49 = vsel %vm318_vm2, %v1563_v47, -inf }
 0x7a7   :  { %1644 = vmax.xlane.f32.xlu1 %v1643_v49  ;;  %v2541_v48 = vld [vmem:[%s3474_s7 + $0x78] sm:$0xff]  ;;  %s3029_s7 = smov 8  }
 0x7a8   :  { %v2960_v49 = vpack.c.bf16 %v2541_v48, %v2540_v46 }
 0x7a9   :  { %v1639_v50 = vpop.f32.mrb[20].mxu1 }
 0x7aa   :  { %v2804_v51 = vpop.f32.mrb[21].mxu1  ;;  %v1646_v52 = vsel %vm318_vm2, %v1639_v50, -inf }
 0x7ab   :  { %1647 = vmax.xlane.f32.xlu0 %v1646_v52 }
 0x834   :  { %v1645_v53 = vpop.xlane.xlu1 %1644 }
 0x835   :  { %v1649_v54 = vsub.f32 %v1563_v47, %v1645_v53  ;;  %v2956_v47 = vpack.c.bf16 %v2539_v45, %v2538_v44 }
 0x837   :  { %v1651_v55 = vmul.f32 1.442695, %v1649_v54 }
 0x838   :  { %v1648_v56 = vpop.xlane.xlu0 %1647 }
 0x839   :  { %2987 = vpow2.f32 %v1651_v55  ;;  %v1650_v57 = vsub.f32 %v1639_v50, %v1648_v56 }
 0x83b   :  { %v1653_v58 = vmul.f32 1.442695, %v1650_v57 }
 0x83d   :  { %2989 = vpow2.f32 %v1653_v58 }
 0x843   :  { %v2988_v59 = vpop.eup %2987 }
 0x844   :  { %v1655_v60 = vsel %vm318_vm2, %v2988_v59, 0.0 }
 0x845   :  { %1656 = vadd.xlane.f32.xlu1 %v1655_v60 }
 0x847   :  { %v2990_v61 = vpop.eup %2989 }
 0x848   :  { %v1658_v62 = vsel %vm318_vm2, %v2990_v61, 0.0 }
 0x849   :  { %1659 = vadd.xlane.f32.xlu0 %v1658_v62 }
 0x8d2   :  { %v1657_v10 = vpop.xlane.xlu1 %1656 }
 0x8d3   :  { %2991 = vrcp.f32 %v1657_v10 }
 0x8d6   :  { %v1660_v12 = vpop.xlane.xlu0 %1659 }
 0x8d7   :  { %2993 = vrcp.f32 %v1660_v12 }
 0x8dd   :  { %v2992_v21 = vpop.eup %2991 }
 0x8de   :  { %v1663_v22 = vmul.f32 %v2992_v21, %v2988_v59 }
 0x8e0   :  { %2808 = vmatmul.mubr.msk.f32.vlgmr.msra.gmra.mrb[16].mxu0 %vm318_vm2, %v1663_v22 }
 0x8e1   :  { %v2994_v28 = vpop.eup %2993  ;;  %2943 = vmatpush3.bf16.msra.mxu0 %v2940_v9  ;;  %2823 = vmatprep.mubr.msk.f32.mxu0 %vm50_vm0, %v3111_v11 }
 0x8e2   :  { %v1664_v29 = vmul.f32 %v2994_v28, %v2990_v61  ;;  %2945 = vmatprep.subr.bf16.mxu0 %v2944_v24 }
 0x8e4   :  { %2813 = vmatmul.mubr.msk.f32.vlgmr.msra.gmra.mrb[22].mxu1 %vm318_vm2, %v1664_v29 }
 0x8e5   :  { %2951 = vmatpush3.bf16.msra.mxu1 %v2948_v7  ;;  %2947 = vmatpush3.bf16.msra.mxu0 %v2944_v24 }
 0x8e6   :  { %2953 = vmatprep.subr.bf16.mxu1 %v2952_v30  ;;  %2834 = vmatprep.mubr.msk.f32.mxu1 %vm50_vm0, %v3118_v13 }
 0x8e7   :  { %2957 = vmatprep.subr.bf16.mxu0 %v2956_v47 }
 0x8e8   :  { %2824 = vmatmul.mubr.msk.f32.vlgmr.msra.gmra.mrb[18].mxu0 %vm50_vm0, %v3125_v14  ;;  %v2527_v14 = vld [vmem:[%s3471_s4 + $0x3] ss:$0 sm:$0xff] }
 0x8e9   :  { %2955 = vmatpush3.bf16.msra.mxu1 %v2952_v30  ;;  %2845 = vmatprep.mubr.msk.f32.mxu0 %vm50_vm0, %v3170_v34 }
 0x8ea   :  { %2848 = vmatprep.subr.mxu1 %v3027_v16  ;;  %2959 = vmatpush3.bf16.msra.mxu0 %v2956_v47 }
 0x8eb   :  { %2961 = vmatprep.subr.bf16.mxu0 %v2960_v49 }
 0x8ec   :  { %2835 = vmatmul.mubr.msk.f32.vlgmr.msra.gmra.mrb[24].mxu1 %vm50_vm0, %v3130_v15 }
 0x8ed   :  { %2850 = vmatprep.mubr.msk.f32.mxu1 %vm3028_vm1, %v3027_v16 }
 0x8ee   :  { %2963 = vmatpush3.bf16.msra.mxu0 %v2960_v49 }
 0x8ef   :  { %2858 = vmatprep.subr.mxu0 %v3027_v16 }
 0x8f1   :  { %2846 = vmatmul.mubr.msk.f32.vlgmr.msra.gmra.mrb[20].mxu0 %vm50_vm0, %v3177_v36 }
 0x8f2   :  { %2860 = vmatprep.mubr.msk.f32.mxu0 %vm3028_vm1, %v3027_v16 }
 0x9b3   :  { %v3396_v11 = vpop.f32.mrb[16].mxu0 }
 0x9b4   :  { %v2809_v31 = vpop.f32.mrb[17].mxu0 }
 0x9b7   :  { %v3398_v32 = vpop.f32.mrb[22].mxu1 }
 0x9b8   :  { %v2814_v13 = vpop.f32.mrb[23].mxu1 }
 0x9bb   :  { %v2825_v33 = vpop.f32.mrb[18].mxu0 }
 0x9bc   :  { %v1890_v34 = vpop.f32.mrb[19].mxu0  ;;  %v1896_v41 = vadd.f32 %v2825_v33, %v2527_v14 }
 0x9bd   :  { %v1891_v15 = vadd.f32 %v2527_v14, %v1890_v34 }
 0x9be   :  { %v1900_v43 = vmul.f32 0.35355338, %v1896_v41 }
 0x9bf   :  { %v2836_v37 = vpop.f32.mrb[24].mxu1  ;;  %v1899_v40 = vmul.f32 0.35355338, %v1891_v15 }
 0x9c0   :  { %v1980_v38 = vpop.f32.mrb[25].mxu1  ;;  %v1986_v42 = vadd.f32 %v2836_v37, %v2535_v35 }
 0x9c1   :  { %v1981_v39 = vadd.f32 %v2535_v35, %v1980_v38 }
 0x9c3   :  { %2849 = vmatpush3.xpose.msk.msra.mxu1 %vm318_vm2, %v1981_v39 }
 0x9c4   :  { %2853 = vmatprep.subr.mxu1 %v3027_v16  ;;  %v2847_v0 = vpop.f32.mrb[20].mxu0 }
 0x9c5   :  { %v2068_v2 = vpop.f32.mrb[21].mxu0  ;;  %v2074_v4 = vadd.f32 %v2847_v0, %v2543_v1 }
 0x9c6   :  { %2851 = vmatmul.mubr.msk.f32.vlgmr.msra.gmra.mrb[26].mxu1 %vm318_vm2, %v1899_v40  ;;  %v2069_v3 = vadd.f32 %v2543_v1, %v2068_v2 }
 0x9c7   :  { %2854 = vmatpush3.xpose.msk.msra.mxu1 %vm318_vm2, %v1986_v42  ;;  %2855 = vmatprep.mubr.msk.f32.mxu1 %vm3028_vm1, %v3027_v16 }
 0x9c8   :  { %2863 = vmatprep.subr.mxu1 %v3027_v16  ;;  %2859 = vmatpush3.msra.mxu0 %v2069_v3 }
 0x9ca   :  { %2856 = vmatmul.mubr.msk.f32.vlgmr.msra.gmra.mrb[28].mxu1 %vm318_vm2, %v1900_v43 }
 0x9cb   :  { %2865 = vmatprep.mubr.msk.f32.mxu1 %vm3028_vm1, %v3027_v16  ;;  %2864 = vmatpush3.msra.mxu1 %v2074_v4 }
 0xa99   :  { %v2149_v50 = vpop.f32.mrb[26].mxu1 }
 0xa9a   :  { %v2852_v51 = vpop.f32.mrb[27].mxu1  ;;  %v2229_v52 = vsel %vm318_vm2, %v2149_v50, -inf }
 0xa9b   :  { %2230 = vmax.xlane.f32.xlu0 %v2229_v52 }
 0xa9d   :  { %v2225_v53 = vpop.f32.mrb[28].mxu1 }
 0xa9e   :  { %v2857_v54 = vpop.f32.mrb[29].mxu1  ;;  %v2232_v55 = vsel %vm318_vm2, %v2225_v53, -inf }
 0xa9f   :  { %2233 = vmax.xlane.f32.xlu1 %v2232_v55 }
 0xb28   :  { %v2231_v56 = vpop.xlane.xlu0 %2230 }
 0xb29   :  { %v2235_v57 = vsub.f32 %v2149_v50, %v2231_v56 }
 0xb2b   :  { %v2237_v58 = vmul.f32 1.442695, %v2235_v57 }
 0xb2c   :  { %v2234_v59 = vpop.xlane.xlu1 %2233 }
 0xb2d   :  { %2995 = vpow2.f32 %v2237_v58  ;;  %v2236_v60 = vsub.f32 %v2225_v53, %v2234_v59 }
 0xb2f   :  { %v2239_v36 = vmul.f32 1.442695, %v2236_v60 }
 0xb31   :  { %2997 = vpow2.f32 %v2239_v36 }
 0xb37   :  { %v2996_v61 = vpop.eup %2995 }
 0xb38   :  { %v2241_v16 = vsel %vm318_vm2, %v2996_v61, 0.0 }
 0xb39   :  { %2242 = vadd.xlane.f32.xlu0 %v2241_v16 }
 0xb3b   :  { %v2998_v62 = vpop.eup %2997 }
 0xb3c   :  { %v2244_v63 = vsel %vm318_vm2, %v2998_v62, 0.0 }
 0xb3d   :  { %2245 = vadd.xlane.f32.xlu1 %v2244_v63 }
 0xb4e   :  { %2401 = vrot.lane.b32.xlu1 %v3315_v25, %s3029_s7 }
 0xb4f   :  { %2399 = vrot.lane.b32.xlu0 %v3313_v23, %s3029_s7 }
 0xb52   :  { %2407 = vrot.lane.b32.xlu1 %v3396_v11, %s3030_s18 }
 0xb56   :  { %2409 = vrot.lane.b32.xlu1 %v3398_v32, %s3030_s18 }
 0xbc6   :  { %v2243_v5 = vpop.xlane.xlu0 %2242 }
 0xbc7   :  { %2999 = vrcp.f32 %v2243_v5 }
 0xbca   :  { %v2246_v25 = vpop.xlane.xlu1 %2245  ;;  %v2400_v22 = vpop.permute.xlu0 %2399 }
 0xbcb   :  { %3001 = vrcp.f32 %v2246_v25  ;;  %v2421_v24 = vsel %vm318_vm2, %v3232_v19, %v2400_v22 }
 0xbce   :  { %v2402_v20 = vpop.permute.xlu1 %2401 }
 0xbcf   :  { %v2422_v30 = vsel %vm318_vm2, %v3230_v17, %v2402_v20 }
 0xbd1   :  { %v3000_v23 = vpop.eup %2999 }
 0xbd2   :  { %v2249_v6 = vmul.f32 %v3000_v23, %v2996_v61  ;;  %v2408_v21 = vpop.permute.xlu1 %2407 }
 0xbd3   :  { %v2424_v26 = vsel %vm2423_vm3, %v2421_v24, %v2408_v21 }
 0xbd4   :  { %2861 = vmatmul.mubr.msk.f32.vlgmr.msra.gmra.mrb[22].mxu0 %vm318_vm2, %v2249_v6 }
 0xbd5   :  { %v3002_v7 = vpop.eup %3001 }
 0xbd6   :  { %v2250_v8 = vmul.f32 %v3002_v7, %v2998_v62  ;;  %v2410_v27 = vpop.permute.xlu1 %2409 }
 0xbd7   :  { %v2425_v11 = vsel %vm2423_vm3, %v2422_v30, %v2410_v27 }
 0xbd8   :  { %2866 = vmatmul.mubr.msk.f32.vlgmr.msra.gmra.mrb[30].mxu1 %vm318_vm2, %v2250_v8 }
 0xca7   :  { %v2320_v9 = vpop.f32.mrb[22].mxu0 }
 0xca8   :  { %2415 = vrot.lane.b32.xlu0 %v2320_v9, %s3031_s8  ;;  %v2862_v10 = vpop.f32.mrb[23].mxu0 }
 0xcab   :  { %v2393_v12 = vpop.f32.mrb[30].mxu1 }
 0xcac   :  { %2417 = vrot.lane.b32.xlu1 %v2393_v12, %s3031_s8  ;;  %v2867_v18 = vpop.f32.mrb[31].mxu1 }
 0xd1a   :  { %v2416_v28 = vpop.permute.xlu0 %2415 }
 0xd1b   :  { %v2427_v29 = vsel %vm2426_vm4, %v2424_v26, %v2416_v28 }
 0xd1c   :  { %2429 = vst.msk [vmem:[#allocation2] sm:$0xff] %vm50_vm0, %v2427_v29 }
 0xd1e   :  { %v2418_v31 = vpop.permute.xlu1 %2417 }
 0xd1f   :  { %v2428_v32 = vsel %vm2426_vm4, %v2425_v11, %v2418_v31 }
 0xd20   :  { %2430 = vst.msk [vmem:[#allocation2 + $0x8] sm:$0xff] %vm50_vm0, %v2428_v32 }
 0xd21   :  { %3014 = shalt.err (!%p3011_p4)
}
 0xd22   :  { %s3015_s24 = scalar_lea.hbm %s3476_s9, 256 }
 0xd23   :  { %p3016_p5 = scmp.ne.s32.totalorder %s3476_s9, %s3015_s24  ;;  %p3019_p6 = scmp.lt.u32.totalorder %s3015_s24, %s3476_s9 }
 0xd25   :  { %p3021_p7 = pnand %p3019_p6, %p3016_p5 }
 0xd27   :  { %3024 = shalt.err (!%p3021_p7)
}
 0xd28   :  { %s3033_s28 = smov 128  }
 0xd29   :  { %2442 = dma.vmem_to_hbm [thread:$0]  %s2437_s20, 256, %s3476_s9, [#allocation3], %s3033_s28, %s3033_s28, %s3029_s7  }
 0xd2a   :  { %3025 = dma.done.wait [#allocation3], 256  }
 0xd2b   :  { %3026 = vsyncadd [#allocation3], 4294967040 }
 0xd2c   :  { %2446 = vsyncpa [#allocation3], 1 }

// kernel: tpu_custom_call.1
= control target key start
LH: loop header
LB: loop body
LE: loop exit
PB: predicated region body
PF: predicated region fallthrough
CT: control target
= control target key end

     0   :  { %vm50_vm0 = vcmask 261120   ;;  %s3467_s0 = inlined_call_operand.vmem [shape: f32[2,8,32], index: 0, kind: input, shape index: {}]   ;;  %s3468_s1 = inlined_call_operand.vmem [shape: f32[2,8,32], index: 1, kind: input, shape index: {}]   ;;  %s3469_s2 = inlined_call_operand.vmem [shape: f32[2,8,32], index: 2, kind: input, shape index: {}]   ;;  %s3470_s3 = inlined_call_operand.vmem [shape: f32[4,32,8], index: 3, kind: input, shape index: {}]   ;;  %s3471_s4 = inlined_call_operand.vmem [shape: f32[4,1,8], index: 4, kind: input, shape index: {}]   ;;  %s3472_s5 = inlined_call_operand.vmem [shape: f32[4,32,8], index: 5, kind: input, shape index: {}]   ;;  %s3473_s6 = inlined_call_operand.vmem [shape: f32[4,1,8], index: 6, kind: input, shape index: {}]   ;;  %s3474_s7 = inlined_call_operand.vmem [shape: f32[4,32,8], index: 7, kind: input, shape index: {}]   ;;  %s3475_s8 = inlined_call_operand.vmem [shape: f32[4,1,8], index: 8, kind: input, shape index: {}]   ;;  %s3476_s9 = inlined_call_operand.hbm [shape: f32[2,8,32], index: 9, kind: output, shape index: {}]  }
   0x1   :  { %v39_v0 = vld [vmem:[%s3470_s3] sm:$0xff]  ;;  %v40_v1 = vld [vmem:[%s3470_s3 + $0x8] sm:$0xff]  ;;  %v41_v5 = vld [vmem:[%s3470_s3 + $0x10] sm:$0xff] }
   0x2   :  { %v134_v2 = vld [vmem:[%s3472_s5] sm:$0xff]  ;;  %v2868_v3 = vpack.c.bf16 %v40_v1, %v39_v0  ;;  %v135_v4 = vld [vmem:[%s3472_s5 + $0x8] sm:$0xff]  ;;  %v42_v6 = vld [vmem:[%s3470_s3 + $0x18] sm:$0xff] }
   0x3   :  { %v2876_v7 = vpack.c.bf16 %v135_v4, %v134_v2  ;;  %v2872_v8 = vpack.c.bf16 %v42_v6, %v41_v5  ;;  %v136_v9 = vld [vmem:[%s3472_s5 + $0x10] sm:$0xff]  ;;  %v137_v10 = vld [vmem:[%s3472_s5 + $0x18] sm:$0xff]  ;;  %v3111_v11 = vld [vmem:[%s3469_s2] sm:$0xff] }
   0x4   :  { %2869 = vmatprep.subr.bf16.mxu0 %v2868_v3  ;;  %v2880_v12 = vpack.c.bf16 %v137_v10, %v136_v9  ;;  %2664 = vmatprep.mubr.msk.f32.mxu0 %vm50_vm0, %v3111_v11  ;;  %v3118_v13 = vld [vmem:[%s3467_s0] sm:$0xff] }
   0x5   :  { %2877 = vmatprep.subr.bf16.mxu1 %v2876_v7  ;;  %2871 = vmatpush3.bf16.msra.mxu0 %v2868_v3 }
   0x6   :  { %14 = vsyncpa [#allocation3], 0  ;;  %2879 = vmatpush3.bf16.msra.mxu1 %v2876_v7  ;;  %2873 = vmatprep.subr.bf16.mxu0 %v2872_v8  ;;  %v3125_v14 = vld [vmem:[%s3469_s2 + $0x8] sm:$0xff]  ;;  %v3027_v16 = vmov 0.0   ;;  %vm3028_vm1 = vmmov 0   ;;  %vm318_vm2 = vcmask 64512  }
   0x7   :  { %2881 = vmatprep.subr.bf16.mxu1 %v2880_v12  ;;  %2675 = vmatprep.mubr.msk.f32.mxu1 %vm50_vm0, %v3118_v13  ;;  %v3130_v15 = vld [vmem:[%s3467_s0 + $0x8] sm:$0xff]  ;;  %v2447_v17 = vld [vmem:[%s3471_s4] ss:$0 sm:$0xff]  ;;  %v228_v31 = vld [vmem:[%s3474_s7 + $0x10] sm:$0xff]  ;;  %s3030_s18 = smov 16   ;;  %vm2423_vm3 = vcmask 130048  }
   0x8   :  { %v2450_v19 = vld [vmem:[%s3473_s6] ss:$0 sm:$0xff]  ;;  %v227_v30 = vld [vmem:[%s3474_s7 + $0x8] sm:$0xff]  ;;  %v229_v33 = vld [vmem:[%s3474_s7 + $0x18] sm:$0xff]  ;;  %vm2426_vm4 = vcmask 195584   ;;  %s3032_s19 = smov [#allocation2]  }
   0x9   :  { %2875 = vmatpush3.bf16.msra.mxu0 %v2872_v8  ;;  %v226_v29 = vld [vmem:[%s3474_s7] sm:$0xff]  ;;  %v2888_v35 = vpack.c.bf16 %v229_v33, %v228_v31  ;;  %v3177_v36 = vld [vmem:[%s3468_s1 + $0x8] sm:$0xff]  ;;  %v2472_v2 = vld [vmem:[%s3472_s5 + $0x30] sm:$0xff]  ;;  %s2436_s20 = sshll.u32 %s3032_s19, 4  ;;  %s2437_s20 = int_to_ptr.vmem [resolvable:$true] %s2436_s20 }
   0xa   :  { %2883 = vmatpush3.bf16.msra.mxu1 %v2880_v12  ;;  %v2884_v32 = vpack.c.bf16 %v227_v30, %v226_v29  ;;  %v3170_v34 = vld [vmem:[%s3468_s1] sm:$0xff]  ;;  %v2471_v58 = vld [vmem:[%s3472_s5 + $0x28] sm:$0xff]  ;;  %v2473_v3 = vld [vmem:[%s3472_s5 + $0x38] sm:$0xff]  ;;  %s3003_s21 = scalar_lea.vmem %s2437_s20, 256  ;;  %p3008_p1 = scmp.lt.s32.totalorder %s2437_s20, %s2437_s20 }
   0xb   :  { %2689 = vmatprep.subr.mxu1 %v3027_v16  ;;  %v2453_v54 = vld [vmem:[%s3475_s8] ss:$0 sm:$0xff]  ;;  %v2463_v62 = vld [vmem:[%s3470_s3 + $0x28] sm:$0xff]  ;;  %v2904_v6 = vpack.c.bf16 %v2473_v3, %v2472_v2  ;;  %v2464_v7 = vld [vmem:[%s3470_s3 + $0x30] sm:$0xff]  ;;  %p3004_p0 = scmp.ne.s32.totalorder %s2437_s20, %s3003_s21  ;;  %p3009_p2 = scmp.lt.s32.totalorder %s3003_s21, %s3003_s21 }
   0xc   :  { %2665 = vmatmul.mubr.msk.f32.vlgmr.msra.gmra.mrb[0].mxu0 %vm50_vm0, %v3125_v14  ;;  %2885 = vmatprep.subr.bf16.mxu0 %v2884_v32  ;;  %v2470_v57 = vld [vmem:[%s3472_s5 + $0x20] sm:$0xff]  ;;  %v2465_v8 = vld [vmem:[%s3470_s3 + $0x38] sm:$0xff]  ;;  %v2501_v2 = vld [vmem:[%s3472_s5 + $0x48] sm:$0xff] }
   0xd   :  { %2676 = vmatmul.mubr.msk.f32.vlgmr.msra.gmra.mrb[0].mxu1 %vm50_vm0, %v3130_v15  ;;  %2686 = vmatprep.mubr.msk.f32.mxu0 %vm50_vm0, %v3170_v34  ;;  %v2900_v60 = vpack.c.bf16 %v2471_v58, %v2470_v57  ;;  %v2462_v61 = vld [vmem:[%s3470_s3 + $0x20] sm:$0xff]  ;;  %v2896_v12 = vpack.c.bf16 %v2465_v8, %v2464_v7  ;;  %v2495_v7 = vld [vmem:[%s3470_s3 + $0x58] sm:$0xff]  ;;  %p3010_p3 = por %p3009_p2, %p3008_p1 }
   0xe   :  { %2691 = vmatprep.mubr.msk.f32.mxu1 %vm3028_vm1, %v3027_v16  ;;  %2887 = vmatpush3.bf16.msra.mxu0 %v2884_v32  ;;  %v2892_v63 = vpack.c.bf16 %v2463_v62, %v2462_v61  ;;  %v2478_v33 = vld [vmem:[%s3474_s7 + $0x20] sm:$0xff] }
   0xf   :  { %2889 = vmatprep.subr.bf16.mxu0 %v2888_v35  ;;  %v2483_v58 = vld [vmem:[%s3475_s8 + $0x1] ss:$0 sm:$0xff]  ;;  %p3011_p4 = pnand %p3010_p3, %p3004_p0 }
  0x10   :  { %v2492_v62 = vld [vmem:[%s3470_s3 + $0x40] sm:$0xff] }
  0x12   :  { %2891 = vmatpush3.bf16.msra.mxu0 %v2888_v35  ;;  %v2479_v35 = vld [vmem:[%s3474_s7 + $0x28] sm:$0xff] }
  0x13   :  { %2699 = vmatprep.subr.mxu0 %v3027_v16 }
  0x15   :  { %2687 = vmatmul.mubr.msk.f32.vlgmr.msra.gmra.mrb[2].mxu0 %vm50_vm0, %v3177_v36 }
  0x16   :  { %2701 = vmatprep.mubr.msk.f32.mxu0 %vm3028_vm1, %v3027_v16 }
  0xdf   :  { %v2666_v18 = vpop.f32.mrb[0].mxu0 }
  0xe0   :  { %v2677_v20 = vpop.f32.mrb[0].mxu1  ;;  %v123_v21 = vpop.f32.mrb[1].mxu0  ;;  %v129_v26 = vadd.f32 %v2666_v18, %v2447_v17 }
  0xe1   :  { %v124_v22 = vadd.f32 %v2447_v17, %v123_v21  ;;  %v217_v23 = vpop.f32.mrb[1].mxu1  ;;  %v223_v27 = vadd.f32 %v2677_v20, %v2450_v19  ;;  %v2475_v21 = vld [vmem:[%s3473_s6 + $0x1] ss:$0 sm:$0xff] }
  0xe2   :  { %v218_v24 = vadd.f32 %v2450_v19, %v217_v23  ;;  %v133_v28 = vmul.f32 0.35355338, %v129_v26 }
  0xe3   :  { %v132_v25 = vmul.f32 0.35355338, %v124_v22 }
  0xe4   :  { %2690 = vmatpush3.xpose.msk.msra.mxu1 %vm318_vm2, %v218_v24 }
  0xe5   :  { %2694 = vmatprep.subr.mxu1 %v3027_v16 }
  0xe7   :  { %2692 = vmatmul.mubr.msk.f32.vlgmr.msra.gmra.mrb[2].mxu1 %vm318_vm2, %v132_v25  ;;  %v2467_v25 = vld [vmem:[%s3471_s4 + $0x1] ss:$0 sm:$0xff] }
  0xe8   :  { %2695 = vmatpush3.xpose.msk.msra.mxu1 %vm318_vm2, %v223_v27  ;;  %2696 = vmatprep.mubr.msk.f32.mxu1 %vm3028_vm1, %v3027_v16  ;;  %v2688_v53 = vpop.f32.mrb[2].mxu0 }
  0xe9   :  { %2704 = vmatprep.subr.mxu1 %v3027_v16  ;;  %v315_v55 = vadd.f32 %v2688_v53, %v2453_v54  ;;  %v309_v56 = vpop.f32.mrb[3].mxu0 }
  0xea   :  { %v310_v59 = vadd.f32 %v2453_v54, %v309_v56 }
  0xeb   :  { %2697 = vmatmul.mubr.msk.f32.vlgmr.msra.gmra.mrb[4].mxu1 %vm318_vm2, %v133_v28 }
  0xec   :  { %2706 = vmatprep.mubr.msk.f32.mxu1 %vm3028_vm1, %v3027_v16  ;;  %2705 = vmatpush3.msra.mxu1 %v315_v55 }
  0xed   :  { %2700 = vmatpush3.msra.mxu0 %v310_v59  ;;  %2901 = vmatprep.subr.bf16.mxu1 %v2900_v60 }
  0xee   :  { %2893 = vmatprep.subr.bf16.mxu0 %v2892_v63 }
 0x1ba   :  { %v391_v37 = vpop.f32.mrb[2].mxu1 }
 0x1bb   :  { %v2693_v38 = vpop.f32.mrb[3].mxu1  ;;  %v471_v42 = vsel %vm318_vm2, %v391_v37, -inf }
 0x1bc   :  { %v2908_v38 = vpack.c.bf16 %v2479_v35, %v2478_v33 }
 0x1be   :  { %v467_v39 = vpop.f32.mrb[4].mxu1 }
 0x1bf   :  { %v2698_v40 = vpop.f32.mrb[5].mxu1  ;;  %v474_v41 = vsel %vm318_vm2, %v467_v39, -inf }
 0x1c0   :  { %475 = vmax.xlane.f32.xlu0 %v474_v41 }
 0x1c4   :  { %472 = vmax.xlane.f32.xlu0 %v471_v42 }
 0x24d   :  { %v476_v43 = vpop.xlane.xlu0 %475 }
 0x24e   :  { %v478_v44 = vsub.f32 %v467_v39, %v476_v43  ;;  %v2481_v39 = vld [vmem:[%s3474_s7 + $0x38] sm:$0xff] }
 0x250   :  { %v481_v45 = vmul.f32 1.442695, %v478_v44 }
 0x251   :  { %v473_v46 = vpop.xlane.xlu0 %472 }
 0x252   :  { %2971 = vpow2.f32 %v481_v45  ;;  %v477_v47 = vsub.f32 %v391_v37, %v473_v46  ;;  %v2480_v37 = vld [vmem:[%s3474_s7 + $0x30] sm:$0xff] }
 0x253   :  { %v2912_v40 = vpack.c.bf16 %v2481_v39, %v2480_v37 }
 0x254   :  { %v479_v48 = vmul.f32 1.442695, %v477_v47 }
 0x256   :  { %2973 = vpow2.f32 %v479_v48 }
 0x25c   :  { %v2972_v49 = vpop.eup %2971 }
 0x25d   :  { %v486_v50 = vsel %vm318_vm2, %v2972_v49, 0.0 }
 0x25e   :  { %487 = vadd.xlane.f32.xlu1 %v486_v50 }
 0x260   :  { %v2974_v51 = vpop.eup %2973 }
 0x261   :  { %v483_v52 = vsel %vm318_vm2, %v2974_v51, 0.0 }
 0x262   :  { %484 = vadd.xlane.f32.xlu1 %v483_v52 }
 0x2eb   :  { %v488_v0 = vpop.xlane.xlu1 %487 }
 0x2ec   :  { %2975 = vrcp.f32 %v488_v0  ;;  %v2500_v0 = vld [vmem:[%s3472_s5 + $0x40] sm:$0xff] }
 0x2ed   :  { %v2924_v3 = vpack.c.bf16 %v2501_v2, %v2500_v0  ;;  %v2513_v0 = vld [vmem:[%s3475_s8 + $0x2] ss:$0 sm:$0xff] }
 0x2ef   :  { %v485_v1 = vpop.xlane.xlu1 %484 }
 0x2f0   :  { %2977 = vrcp.f32 %v485_v1 }
 0x2f6   :  { %v2976_v4 = vpop.eup %2975 }
 0x2f7   :  { %v492_v5 = vmul.f32 %v2976_v4, %v2972_v49 }
 0x2f9   :  { %2707 = vmatmul.mubr.msk.f32.vlgmr.msra.gmra.mrb[6].mxu1 %vm318_vm2, %v492_v5 }
 0x2fa   :  { %v2978_v9 = vpop.eup %2977  ;;  %2903 = vmatpush3.bf16.msra.mxu1 %v2900_v60  ;;  %2728 = vmatprep.mubr.msk.f32.mxu1 %vm50_vm0, %v3118_v13 }
 0x2fb   :  { %v491_v10 = vmul.f32 %v2978_v9, %v2974_v51  ;;  %2905 = vmatprep.subr.bf16.mxu1 %v2904_v6 }
 0x2fd   :  { %2702 = vmatmul.mubr.msk.f32.vlgmr.msra.gmra.mrb[4].mxu0 %vm318_vm2, %v491_v10 }
 0x2fe   :  { %2895 = vmatpush3.bf16.msra.mxu0 %v2892_v63  ;;  %2907 = vmatpush3.bf16.msra.mxu1 %v2904_v6  ;;  %v2493_v63 = vld [vmem:[%s3470_s3 + $0x48] sm:$0xff]  ;;  %v2494_v6 = vld [vmem:[%s3470_s3 + $0x50] sm:$0xff] }
 0x2ff   :  { %2897 = vmatprep.subr.bf16.mxu0 %v2896_v12  ;;  %2717 = vmatprep.mubr.msk.f32.mxu0 %vm50_vm0, %v3111_v11  ;;  %v2916_v1 = vpack.c.bf16 %v2493_v63, %v2492_v62  ;;  %v2920_v10 = vpack.c.bf16 %v2495_v7, %v2494_v6  ;;  %v2522_v6 = vld [vmem:[%s3470_s3 + $0x60] sm:$0xff] }
 0x300   :  { %2742 = vmatprep.subr.mxu1 %v3027_v16 }
 0x301   :  { %2729 = vmatmul.mubr.msk.f32.vlgmr.msra.gmra.mrb[8].mxu1 %vm50_vm0, %v3130_v15 }
 0x302   :  { %2899 = vmatpush3.bf16.msra.mxu0 %v2896_v12  ;;  %2744 = vmatprep.mubr.msk.f32.mxu1 %vm3028_vm1, %v3027_v16  ;;  %v2502_v12 = vld [vmem:[%s3472_s5 + $0x50] sm:$0xff] }
 0x303   :  { %2909 = vmatprep.subr.bf16.mxu0 %v2908_v38 }
 0x305   :  { %2718 = vmatmul.mubr.msk.f32.vlgmr.msra.gmra.mrb[6].mxu0 %vm50_vm0, %v3125_v14 }
 0x306   :  { %2739 = vmatprep.mubr.msk.f32.mxu0 %vm50_vm0, %v3170_v34  ;;  %2911 = vmatpush3.bf16.msra.mxu0 %v2908_v38 }
 0x307   :  { %2913 = vmatprep.subr.bf16.mxu0 %v2912_v40 }
 0x30a   :  { %2915 = vmatpush3.bf16.msra.mxu0 %v2912_v40 }
 0x30b   :  { %2752 = vmatprep.subr.mxu0 %v3027_v16 }
 0x30d   :  { %2740 = vmatmul.mubr.msk.f32.vlgmr.msra.gmra.mrb[8].mxu0 %vm50_vm0, %v3177_v36 }
 0x30e   :  { %2754 = vmatprep.mubr.msk.f32.mxu0 %vm3028_vm1, %v3027_v16 }
 0x3cc   :  { %v3230_v17 = vpop.f32.mrb[6].mxu1 }
 0x3cd   :  { %v2708_v18 = vpop.f32.mrb[7].mxu1 }
 0x3ce   :  { %v2503_v18 = vld [vmem:[%s3472_s5 + $0x58] sm:$0xff] }
 0x3d0   :  { %v3232_v19 = vpop.f32.mrb[4].mxu0 }
 0x3d1   :  { %v2703_v20 = vpop.f32.mrb[5].mxu0 }
 0x3d4   :  { %v2730_v22 = vpop.f32.mrb[8].mxu1 }
 0x3d5   :  { %v808_v23 = vpop.f32.mrb[9].mxu1  ;;  %v814_v31 = vadd.f32 %v2730_v22, %v2475_v21  ;;  %v2928_v22 = vpack.c.bf16 %v2503_v18, %v2502_v12  ;;  %v2524_v18 = vld [vmem:[%s3470_s3 + $0x70] sm:$0xff] }
 0x3d6   :  { %v809_v24 = vadd.f32 %v2475_v21, %v808_v23 }
 0x3d8   :  { %v2719_v26 = vpop.f32.mrb[6].mxu0  ;;  %2743 = vmatpush3.xpose.msk.msra.mxu1 %vm318_vm2, %v809_v24 }
 0x3d9   :  { %v718_v27 = vpop.f32.mrb[7].mxu0  ;;  %2747 = vmatprep.subr.mxu1 %v3027_v16  ;;  %v724_v29 = vadd.f32 %v2719_v26, %v2467_v25 }
 0x3da   :  { %v719_v28 = vadd.f32 %v2467_v25, %v718_v27 }
 0x3db   :  { %v728_v32 = vmul.f32 0.35355338, %v724_v29 }
 0x3dc   :  { %v727_v30 = vmul.f32 0.35355338, %v719_v28  ;;  %v2497_v28 = vld [vmem:[%s3471_s4 + $0x2] ss:$0 sm:$0xff] }
 0x3de   :  { %2745 = vmatmul.mubr.msk.f32.vlgmr.msra.gmra.mrb[10].mxu1 %vm318_vm2, %v727_v30  ;;  %v2505_v30 = vld [vmem:[%s3473_s6 + $0x2] ss:$0 sm:$0xff] }
 0x3df   :  { %2748 = vmatpush3.xpose.msk.msra.mxu1 %vm318_vm2, %v814_v31  ;;  %2749 = vmatprep.mubr.msk.f32.mxu1 %vm3028_vm1, %v3027_v16 }
 0x3e0   :  { %2757 = vmatprep.subr.mxu1 %v3027_v16  ;;  %v2741_v57 = vpop.f32.mrb[8].mxu0 }
 0x3e1   :  { %v896_v59 = vpop.f32.mrb[9].mxu0  ;;  %v902_v61 = vadd.f32 %v2741_v57, %v2483_v58 }
 0x3e2   :  { %2750 = vmatmul.mubr.msk.f32.vlgmr.msra.gmra.mrb[12].mxu1 %vm318_vm2, %v728_v32  ;;  %v897_v60 = vadd.f32 %v2483_v58, %v896_v59 }
 0x3e3   :  { %2759 = vmatprep.mubr.msk.f32.mxu1 %vm3028_vm1, %v3027_v16  ;;  %2758 = vmatpush3.msra.mxu1 %v902_v61 }
 0x3e4   :  { %2753 = vmatpush3.msra.mxu0 %v897_v60  ;;  %2925 = vmatprep.subr.bf16.mxu1 %v2924_v3 }
 0x3e5   :  { %2917 = vmatprep.subr.bf16.mxu0 %v2916_v1 }
 0x4b1   :  { %v977_v41 = vpop.f32.mrb[10].mxu1 }
 0x4b2   :  { %v2746_v42 = vpop.f32.mrb[11].mxu1  ;;  %v1057_v43 = vsel %vm318_vm2, %v977_v41, -inf }
 0x4b3   :  { %1058 = vmax.xlane.f32.xlu1 %v1057_v43  ;;  %v2509_v42 = vld [vmem:[%s3474_s7 + $0x48] sm:$0xff]  ;;  %v2510_v43 = vld [vmem:[%s3474_s7 + $0x50] sm:$0xff] }
 0x4b5   :  { %v1053_v44 = vpop.f32.mrb[12].mxu1 }
 0x4b6   :  { %v2751_v45 = vpop.f32.mrb[13].mxu1  ;;  %v1060_v46 = vsel %vm318_vm2, %v1053_v44, -inf }
 0x4b7   :  { %1061 = vmax.xlane.f32.xlu0 %v1060_v46  ;;  %v2511_v45 = vld [vmem:[%s3474_s7 + $0x58] sm:$0xff] }
 0x4b8   :  { %v2936_v46 = vpack.c.bf16 %v2511_v45, %v2510_v43  ;;  %v2539_v45 = vld [vmem:[%s3474_s7 + $0x68] sm:$0xff] }
 0x540   :  { %v1059_v47 = vpop.xlane.xlu1 %1058 }
 0x541   :  { %v1063_v48 = vsub.f32 %v977_v41, %v1059_v47  ;;  %v2508_v41 = vld [vmem:[%s3474_s7 + $0x40] sm:$0xff] }
 0x543   :  { %v1065_v49 = vmul.f32 1.442695, %v1063_v48 }
 0x544   :  { %v1062_v50 = vpop.xlane.xlu0 %1061 }
 0x545   :  { %2979 = vpow2.f32 %v1065_v49  ;;  %v1064_v51 = vsub.f32 %v1053_v44, %v1062_v50  ;;  %v2932_v44 = vpack.c.bf16 %v2509_v42, %v2508_v41 }
 0x547   :  { %v1067_v52 = vmul.f32 1.442695, %v1064_v51 }
 0x549   :  { %2981 = vpow2.f32 %v1067_v52 }
 0x54f   :  { %v2980_v53 = vpop.eup %2979 }
 0x550   :  { %v1069_v54 = vsel %vm318_vm2, %v2980_v53, 0.0 }
 0x551   :  { %1070 = vadd.xlane.f32.xlu1 %v1069_v54 }
 0x553   :  { %v2982_v55 = vpop.eup %2981 }
 0x554   :  { %v1072_v56 = vsel %vm318_vm2, %v2982_v55, 0.0 }
 0x555   :  { %1073 = vadd.xlane.f32.xlu0 %v1072_v56 }
 0x5de   :  { %v1071_v4 = vpop.xlane.xlu1 %1070 }
 0x5df   :  { %2983 = vrcp.f32 %v1071_v4  ;;  %v2530_v4 = vld [vmem:[%s3472_s5 + $0x60] sm:$0xff] }
 0x5e2   :  { %v1074_v5 = vpop.xlane.xlu0 %1073 }
 0x5e3   :  { %2985 = vrcp.f32 %v1074_v5  ;;  %v2531_v5 = vld [vmem:[%s3472_s5 + $0x68] sm:$0xff] }
 0x5e4   :  { %v2948_v7 = vpack.c.bf16 %v2531_v5, %v2530_v4 }
 0x5e9   :  { %v2984_v8 = vpop.eup %2983 }
 0x5ea   :  { %v1077_v9 = vmul.f32 %v2984_v8, %v2980_v53  ;;  %v2523_v8 = vld [vmem:[%s3470_s3 + $0x68] sm:$0xff] }
 0x5ec   :  { %2755 = vmatmul.mubr.msk.f32.vlgmr.msra.gmra.mrb[10].mxu0 %vm318_vm2, %v1077_v9  ;;  %v2940_v9 = vpack.c.bf16 %v2523_v8, %v2522_v6 }
 0x5ed   :  { %v2986_v20 = vpop.eup %2985  ;;  %2919 = vmatpush3.bf16.msra.mxu0 %v2916_v1  ;;  %2770 = vmatprep.mubr.msk.f32.mxu0 %vm50_vm0, %v3111_v11 }
 0x5ee   :  { %v1078_v21 = vmul.f32 %v2986_v20, %v2982_v55  ;;  %2921 = vmatprep.subr.bf16.mxu0 %v2920_v10  ;;  %v2525_v20 = vld [vmem:[%s3470_s3 + $0x78] sm:$0xff] }
 0x5f0   :  { %2760 = vmatmul.mubr.msk.f32.vlgmr.msra.gmra.mrb[14].mxu1 %vm318_vm2, %v1078_v21 }
 0x5f1   :  { %2927 = vmatpush3.bf16.msra.mxu1 %v2924_v3  ;;  %2923 = vmatpush3.bf16.msra.mxu0 %v2920_v10 }
 0x5f2   :  { %2929 = vmatprep.subr.bf16.mxu1 %v2928_v22  ;;  %2781 = vmatprep.mubr.msk.f32.mxu1 %vm50_vm0, %v3118_v13 }
 0x5f3   :  { %2933 = vmatprep.subr.bf16.mxu0 %v2932_v44 }
 0x5f4   :  { %2771 = vmatmul.mubr.msk.f32.vlgmr.msra.gmra.mrb[12].mxu0 %vm50_vm0, %v3125_v14 }
 0x5f5   :  { %2931 = vmatpush3.bf16.msra.mxu1 %v2928_v22  ;;  %2792 = vmatprep.mubr.msk.f32.mxu0 %vm50_vm0, %v3170_v34 }
 0x5f6   :  { %2795 = vmatprep.subr.mxu1 %v3027_v16  ;;  %2935 = vmatpush3.bf16.msra.mxu0 %v2932_v44  ;;  %v2538_v44 = vld [vmem:[%s3474_s7 + $0x60] sm:$0xff] }
 0x5f7   :  { %2937 = vmatprep.subr.bf16.mxu0 %v2936_v46 }
 0x5f8   :  { %2782 = vmatmul.mubr.msk.f32.vlgmr.msra.gmra.mrb[16].mxu1 %vm50_vm0, %v3130_v15 }
 0x5f9   :  { %2797 = vmatprep.mubr.msk.f32.mxu1 %vm3028_vm1, %v3027_v16 }
 0x5fa   :  { %2939 = vmatpush3.bf16.msra.mxu0 %v2936_v46  ;;  %v2540_v46 = vld [vmem:[%s3474_s7 + $0x70] sm:$0xff] }
 0x5fb   :  { %2805 = vmatprep.subr.mxu0 %v3027_v16 }
 0x5fd   :  { %2793 = vmatmul.mubr.msk.f32.vlgmr.msra.gmra.mrb[14].mxu0 %vm50_vm0, %v3177_v36 }
 0x5fe   :  { %2807 = vmatprep.mubr.msk.f32.mxu0 %vm3028_vm1, %v3027_v16 }
 0x6bf   :  { %v3313_v23 = vpop.f32.mrb[10].mxu0 }
 0x6c0   :  { %v2756_v24 = vpop.f32.mrb[11].mxu0 }
 0x6c1   :  { %v2944_v24 = vpack.c.bf16 %v2525_v20, %v2524_v18 }
 0x6c3   :  { %v3315_v25 = vpop.f32.mrb[14].mxu1 }
 0x6c4   :  { %v2761_v26 = vpop.f32.mrb[15].mxu1 }
 0x6c5   :  { %v2532_v26 = vld [vmem:[%s3472_s5 + $0x70] sm:$0xff] }
 0x6c7   :  { %v2772_v27 = vpop.f32.mrb[12].mxu0 }
 0x6c8   :  { %v1304_v29 = vpop.f32.mrb[13].mxu0  ;;  %v1310_v38 = vadd.f32 %v2772_v27, %v2497_v28  ;;  %v2533_v27 = vld [vmem:[%s3472_s5 + $0x78] sm:$0xff] }
 0x6c9   :  { %v1305_v31 = vadd.f32 %v2497_v28, %v1304_v29 }
 0x6ca   :  { %v1314_v40 = vmul.f32 0.35355338, %v1310_v38 }
 0x6cb   :  { %v2783_v32 = vpop.f32.mrb[16].mxu1  ;;  %v1313_v37 = vmul.f32 0.35355338, %v1305_v31 }
 0x6cc   :  { %v1394_v33 = vpop.f32.mrb[17].mxu1  ;;  %v1400_v39 = vadd.f32 %v2783_v32, %v2505_v30 }
 0x6cd   :  { %v1395_v35 = vadd.f32 %v2505_v30, %v1394_v33  ;;  %v2952_v30 = vpack.c.bf16 %v2533_v27, %v2532_v26 }
 0x6cf   :  { %2796 = vmatpush3.xpose.msk.msra.mxu1 %vm318_vm2, %v1395_v35  ;;  %v2535_v35 = vld [vmem:[%s3473_s6 + $0x3] ss:$0 sm:$0xff] }
 0x6d0   :  { %2800 = vmatprep.subr.mxu1 %v3027_v16  ;;  %v2794_v63 = vpop.f32.mrb[14].mxu0 }
 0x6d1   :  { %v1482_v1 = vpop.f32.mrb[15].mxu0  ;;  %v1488_v3 = vadd.f32 %v2794_v63, %v2513_v0 }
 0x6d2   :  { %2798 = vmatmul.mubr.msk.f32.vlgmr.msra.gmra.mrb[18].mxu1 %vm318_vm2, %v1313_v37  ;;  %v1483_v2 = vadd.f32 %v2513_v0, %v1482_v1  ;;  %v2543_v1 = vld [vmem:[%s3475_s8 + $0x3] ss:$0 sm:$0xff]  ;;  %s3031_s8 = smov 24  }
 0x6d3   :  { %2801 = vmatpush3.xpose.msk.msra.mxu1 %vm318_vm2, %v1400_v39  ;;  %2802 = vmatprep.mubr.msk.f32.mxu1 %vm3028_vm1, %v3027_v16 }
 0x6d4   :  { %2810 = vmatprep.subr.mxu1 %v3027_v16  ;;  %2806 = vmatpush3.msra.mxu0 %v1483_v2 }
 0x6d5   :  { %2941 = vmatprep.subr.bf16.mxu0 %v2940_v9 }
 0x6d6   :  { %2803 = vmatmul.mubr.msk.f32.vlgmr.msra.gmra.mrb[20].mxu1 %vm318_vm2, %v1314_v40 }
 0x6d7   :  { %2812 = vmatprep.mubr.msk.f32.mxu1 %vm3028_vm1, %v3027_v16  ;;  %2811 = vmatpush3.msra.mxu1 %v1488_v3 }
 0x6d8   :  { %2949 = vmatprep.subr.bf16.mxu1 %v2948_v7 }
 0x7a5   :  { %v1563_v47 = vpop.f32.mrb[18].mxu1 }
 0x7a6   :  { %v2799_v48 = vpop.f32.mrb[19].mxu1  ;;  %v1643_v49 = vsel %vm318_vm2, %v1563_v47, -inf }
 0x7a7   :  { %1644 = vmax.xlane.f32.xlu1 %v1643_v49  ;;  %v2541_v48 = vld [vmem:[%s3474_s7 + $0x78] sm:$0xff]  ;;  %s3029_s7 = smov 8  }
 0x7a8   :  { %v2960_v49 = vpack.c.bf16 %v2541_v48, %v2540_v46 }
 0x7a9   :  { %v1639_v50 = vpop.f32.mrb[20].mxu1 }
 0x7aa   :  { %v2804_v51 = vpop.f32.mrb[21].mxu1  ;;  %v1646_v52 = vsel %vm318_vm2, %v1639_v50, -inf }
 0x7ab   :  { %1647 = vmax.xlane.f32.xlu0 %v1646_v52 }
 0x834   :  { %v1645_v53 = vpop.xlane.xlu1 %1644 }
 0x835   :  { %v1649_v54 = vsub.f32 %v1563_v47, %v1645_v53  ;;  %v2956_v47 = vpack.c.bf16 %v2539_v45, %v2538_v44 }
 0x837   :  { %v1651_v55 = vmul.f32 1.442695, %v1649_v54 }
 0x838   :  { %v1648_v56 = vpop.xlane.xlu0 %1647 }
 0x839   :  { %2987 = vpow2.f32 %v1651_v55  ;;  %v1650_v57 = vsub.f32 %v1639_v50, %v1648_v56 }
 0x83b   :  { %v1653_v58 = vmul.f32 1.442695, %v1650_v57 }
 0x83d   :  { %2989 = vpow2.f32 %v1653_v58 }
 0x843   :  { %v2988_v59 = vpop.eup %2987 }
 0x844   :  { %v1655_v60 = vsel %vm318_vm2, %v2988_v59, 0.0 }
 0x845   :  { %1656 = vadd.xlane.f32.xlu1 %v1655_v60 }
 0x847   :  { %v2990_v61 = vpop.eup %2989 }
 0x848   :  { %v1658_v62 = vsel %vm318_vm2, %v2990_v61, 0.0 }
 0x849   :  { %1659 = vadd.xlane.f32.xlu0 %v1658_v62 }
 0x8d2   :  { %v1657_v10 = vpop.xlane.xlu1 %1656 }
 0x8d3   :  { %2991 = vrcp.f32 %v1657_v10 }
 0x8d6   :  { %v1660_v12 = vpop.xlane.xlu0 %1659 }
 0x8d7   :  { %2993 = vrcp.f32 %v1660_v12 }
 0x8dd   :  { %v2992_v21 = vpop.eup %2991 }
 0x8de   :  { %v1663_v22 = vmul.f32 %v2992_v21, %v2988_v59 }
 0x8e0   :  { %2808 = vmatmul.mubr.msk.f32.vlgmr.msra.gmra.mrb[16].mxu0 %vm318_vm2, %v1663_v22 }
 0x8e1   :  { %v2994_v28 = vpop.eup %2993  ;;  %2943 = vmatpush3.bf16.msra.mxu0 %v2940_v9  ;;  %2823 = vmatprep.mubr.msk.f32.mxu0 %vm50_vm0, %v3111_v11 }
 0x8e2   :  { %v1664_v29 = vmul.f32 %v2994_v28, %v2990_v61  ;;  %2945 = vmatprep.subr.bf16.mxu0 %v2944_v24 }
 0x8e4   :  { %2813 = vmatmul.mubr.msk.f32.vlgmr.msra.gmra.mrb[22].mxu1 %vm318_vm2, %v1664_v29 }
 0x8e5   :  { %2951 = vmatpush3.bf16.msra.mxu1 %v2948_v7  ;;  %2947 = vmatpush3.bf16.msra.mxu0 %v2944_v24 }
 0x8e6   :  { %2953 = vmatprep.subr.bf16.mxu1 %v2952_v30  ;;  %2834 = vmatprep.mubr.msk.f32.mxu1 %vm50_vm0, %v3118_v13 }
 0x8e7   :  { %2957 = vmatprep.subr.bf16.mxu0 %v2956_v47 }
 0x8e8   :  { %2824 = vmatmul.mubr.msk.f32.vlgmr.msra.gmra.mrb[18].mxu0 %vm50_vm0, %v3125_v14  ;;  %v2527_v14 = vld [vmem:[%s3471_s4 + $0x3] ss:$0 sm:$0xff] }
 0x8e9   :  { %2955 = vmatpush3.bf16.msra.mxu1 %v2952_v30  ;;  %2845 = vmatprep.mubr.msk.f32.mxu0 %vm50_vm0, %v3170_v34 }
 0x8ea   :  { %2848 = vmatprep.subr.mxu1 %v3027_v16  ;;  %2959 = vmatpush3.bf16.msra.mxu0 %v2956_v47 }
 0x8eb   :  { %2961 = vmatprep.subr.bf16.mxu0 %v2960_v49 }
 0x8ec   :  { %2835 = vmatmul.mubr.msk.f32.vlgmr.msra.gmra.mrb[24].mxu1 %vm50_vm0, %v3130_v15 }
 0x8ed   :  { %2850 = vmatprep.mubr.msk.f32.mxu1 %vm3028_vm1, %v3027_v16 }
 0x8ee   :  { %2963 = vmatpush3.bf16.msra.mxu0 %v2960_v49 }
 0x8ef   :  { %2858 = vmatprep.subr.mxu0 %v3027_v16 }
 0x8f1   :  { %2846 = vmatmul.mubr.msk.f32.vlgmr.msra.gmra.mrb[20].mxu0 %vm50_vm0, %v3177_v36 }
 0x8f2   :  { %2860 = vmatprep.mubr.msk.f32.mxu0 %vm3028_vm1, %v3027_v16 }
 0x9b3   :  { %v3396_v11 = vpop.f32.mrb[16].mxu0 }
 0x9b4   :  { %v2809_v31 = vpop.f32.mrb[17].mxu0 }
 0x9b7   :  { %v3398_v32 = vpop.f32.mrb[22].mxu1 }
 0x9b8   :  { %v2814_v13 = vpop.f32.mrb[23].mxu1 }
 0x9bb   :  { %v2825_v33 = vpop.f32.mrb[18].mxu0 }
 0x9bc   :  { %v1890_v34 = vpop.f32.mrb[19].mxu0  ;;  %v1896_v41 = vadd.f32 %v2825_v33, %v2527_v14 }
 0x9bd   :  { %v1891_v15 = vadd.f32 %v2527_v14, %v1890_v34 }
 0x9be   :  { %v1900_v43 = vmul.f32 0.35355338, %v1896_v41 }
 0x9bf   :  { %v2836_v37 = vpop.f32.mrb[24].mxu1  ;;  %v1899_v40 = vmul.f32 0.35355338, %v1891_v15 }
 0x9c0   :  { %v1980_v38 = vpop.f32.mrb[25].mxu1  ;;  %v1986_v42 = vadd.f32 %v2836_v37, %v2535_v35 }
 0x9c1   :  { %v1981_v39 = vadd.f32 %v2535_v35, %v1980_v38 }
 0x9c3   :  { %2849 = vmatpush3.xpose.msk.msra.mxu1 %vm318_vm2, %v1981_v39 }
 0x9c4   :  { %2853 = vmatprep.subr.mxu1 %v3027_v16  ;;  %v2847_v0 = vpop.f32.mrb[20].mxu0 }
 0x9c5   :  { %v2068_v2 = vpop.f32.mrb[21].mxu0  ;;  %v2074_v4 = vadd.f32 %v2847_v0, %v2543_v1 }
 0x9c6   :  { %2851 = vmatmul.mubr.msk.f32.vlgmr.msra.gmra.mrb[26].mxu1 %vm318_vm2, %v1899_v40  ;;  %v2069_v3 = vadd.f32 %v2543_v1, %v2068_v2 }
 0x9c7   :  { %2854 = vmatpush3.xpose.msk.msra.mxu1 %vm318_vm2, %v1986_v42  ;;  %2855 = vmatprep.mubr.msk.f32.mxu1 %vm3028_vm1, %v3027_v16 }
 0x9c8   :  { %2863 = vmatprep.subr.mxu1 %v3027_v16  ;;  %2859 = vmatpush3.msra.mxu0 %v2069_v3 }
 0x9ca   :  { %2856 = vmatmul.mubr.msk.f32.vlgmr.msra.gmra.mrb[28].mxu1 %vm318_vm2, %v1900_v43 }
 0x9cb   :  { %2865 = vmatprep.mubr.msk.f32.mxu1 %vm3028_vm1, %v3027_v16  ;;  %2864 = vmatpush3.msra.mxu1 %v2074_v4 }
 0xa99   :  { %v2149_v50 = vpop.f32.mrb[26].mxu1 }
 0xa9a   :  { %v2852_v51 = vpop.f32.mrb[27].mxu1  ;;  %v2229_v52 = vsel %vm318_vm2, %v2149_v50, -inf }
 0xa9b   :  { %2230 = vmax.xlane.f32.xlu0 %v2229_v52 }
 0xa9d   :  { %v2225_v53 = vpop.f32.mrb[28].mxu1 }
 0xa9e   :  { %v2857_v54 = vpop.f32.mrb[29].mxu1  ;;  %v2232_v55 = vsel %vm318_vm2, %v2225_v53, -inf }
 0xa9f   :  { %2233 = vmax.xlane.f32.xlu1 %v2232_v55 }
 0xb28   :  { %v2231_v56 = vpop.xlane.xlu0 %2230 }
 0xb29   :  { %v2235_v57 = vsub.f32 %v2149_v50, %v2231_v56 }
 0xb2b   :  { %v2237_v58 = vmul.f32 1.442695, %v2235_v57 }
 0xb2c   :  { %v2234_v59 = vpop.xlane.xlu1 %2233 }
 0xb2d   :  { %2995 = vpow2.f32 %v2237_v58  ;;  %v2236_v60 = vsub.f32 %v2225_v53, %v2234_v59 }
 0xb2f   :  { %v2239_v36 = vmul.f32 1.442695, %v2236_v60 }
 0xb31   :  { %2997 = vpow2.f32 %v2239_v36 }
 0xb37   :  { %v2996_v61 = vpop.eup %2995 }
 0xb38   :  { %v2241_v16 = vsel %vm318_vm2, %v2996_v61, 0.0 }
 0xb39   :  { %2242 = vadd.xlane.f32.xlu0 %v2241_v16 }
 0xb3b   :  { %v2998_v62 = vpop.eup %2997 }
 0xb3c   :  { %v2244_v63 = vsel %vm318_vm2, %v2998_v62, 0.0 }
 0xb3d   :  { %2245 = vadd.xlane.f32.xlu1 %v2244_v63 }
 0xb4e   :  { %2401 = vrot.lane.b32.xlu1 %v3315_v25, %s3029_s7 }
 0xb4f   :  { %2399 = vrot.lane.b32.xlu0 %v3313_v23, %s3029_s7 }
 0xb52   :  { %2407 = vrot.lane.b32.xlu1 %v3396_v11, %s3030_s18 }
 0xb56   :  { %2409 = vrot.lane.b32.xlu1 %v3398_v32, %s3030_s18 }
 0xbc6   :  { %v2243_v5 = vpop.xlane.xlu0 %2242 }
 0xbc7   :  { %2999 = vrcp.f32 %v2243_v5 }
 0xbca   :  { %v2246_v25 = vpop.xlane.xlu1 %2245  ;;  %v2400_v22 = vpop.permute.xlu0 %2399 }
 0xbcb   :  { %3001 = vrcp.f32 %v2246_v25  ;;  %v2421_v24 = vsel %vm318_vm2, %v3232_v19, %v2400_v22 }
 0xbce   :  { %v2402_v20 = vpop.permute.xlu1 %2401 }
 0xbcf   :  { %v2422_v30 = vsel %vm318_vm2, %v3230_v17, %v2402_v20 }
 0xbd1   :  { %v3000_v23 = vpop.eup %2999 }
 0xbd2   :  { %v2249_v6 = vmul.f32 %v3000_v23, %v2996_v61  ;;  %v2408_v21 = vpop.permute.xlu1 %2407 }
 0xbd3   :  { %v2424_v26 = vsel %vm2423_vm3, %v2421_v24, %v2408_v21 }
 0xbd4   :  { %2861 = vmatmul.mubr.msk.f32.vlgmr.msra.gmra.mrb[22].mxu0 %vm318_vm2, %v2249_v6 }
 0xbd5   :  { %v3002_v7 = vpop.eup %3001 }
 0xbd6   :  { %v2250_v8 = vmul.f32 %v3002_v7, %v2998_v62  ;;  %v2410_v27 = vpop.permute.xlu1 %2409 }
 0xbd7   :  { %v2425_v11 = vsel %vm2423_vm3, %v2422_v30, %v2410_v27 }
 0xbd8   :  { %2866 = vmatmul.mubr.msk.f32.vlgmr.msra.gmra.mrb[30].mxu1 %vm318_vm2, %v2250_v8 }
 0xca7   :  { %v2320_v9 = vpop.f32.mrb[22].mxu0 }
 0xca8   :  { %2415 = vrot.lane.b32.xlu0 %v2320_v9, %s3031_s8  ;;  %v2862_v10 = vpop.f32.mrb[23].mxu0 }
 0xcab   :  { %v2393_v12 = vpop.f32.mrb[30].mxu1 }
 0xcac   :  { %2417 = vrot.lane.b32.xlu1 %v2393_v12, %s3031_s8  ;;  %v2867_v18 = vpop.f32.mrb[31].mxu1 }
 0xd1a   :  { %v2416_v28 = vpop.permute.xlu0 %2415 }
 0xd1b   :  { %v2427_v29 = vsel %vm2426_vm4, %v2424_v26, %v2416_v28 }
 0xd1c   :  { %2429 = vst.msk [vmem:[#allocation2] sm:$0xff] %vm50_vm0, %v2427_v29 }
 0xd1e   :  { %v2418_v31 = vpop.permute.xlu1 %2417 }
 0xd1f   :  { %v2428_v32 = vsel %vm2426_vm4, %v2425_v11, %v2418_v31 }
 0xd20   :  { %2430 = vst.msk [vmem:[#allocation2 + $0x8] sm:$0xff] %vm50_vm0, %v2428_v32 }
 0xd21   :  { %3014 = shalt.err (!%p3011_p4)
}
 0xd22   :  { %s3015_s24 = scalar_lea.hbm %s3476_s9, 256 }
 0xd23   :  { %p3016_p5 = scmp.ne.s32.totalorder %s3476_s9, %s3015_s24  ;;  %p3019_p6 = scmp.lt.u32.totalorder %s3015_s24, %s3476_s9 }
 0xd25   :  { %p3021_p7 = pnand %p3019_p6, %p3016_p5 }
 0xd27   :  { %3024 = shalt.err (!%p3021_p7)
}
 0xd28   :  { %s3033_s28 = smov 128  }
 0xd29   :  { %2442 = dma.vmem_to_hbm [thread:$0]  %s2437_s20, 256, %s3476_s9, [#allocation3], %s3033_s28, %s3033_s28, %s3029_s7  }
 0xd2a   :  { %3025 = dma.done.wait [#allocation3], 256  }
 0xd2b   :  { %3026 = vsyncadd [#allocation3], 4294967040 }
 0xd2c   :  { %2446 = vsyncpa [#allocation3], 1 }

</bundles_post_ra>
